<compile_context>
chip_gen: v6e
topology: v6e:2x2x1
jax: 0.10.0
libtpu: 0.0.40
codegen_flags: <defaults>
</compile_context>

<pallas_src>
import numpy as np
import jax
import jax.numpy as jnp
from jax import lax
from jax.experimental import pallas as pl
from jax.experimental.pallas import tpu as pltpu

INPUT_MEAN = np.array([0.2788, 0.2657, 0.2629], np.float32)
INPUT_STD = np.array([0.2064, 0.1944, 0.2252], np.float32)
BN_EPS = 1e-5


# ---------------------------------------------------------------------------
# Single fused kernel: full Detector forward, `group` images per grid step.
# Activations are (M, C_framed) with M = group * P rows (grid pixels) and the
# framed channels in the lane dimension.
# ---------------------------------------------------------------------------
def _detector_kernel(x_ref,
                     w1_ref, s1_ref, b1_ref,
                     w2_ref, s2_ref, b2_ref,
                     w3_ref, s3_ref, b3_ref,
                     w4_ref, s4_ref, b4_ref,
                     wh_ref, bh_ref,
                     seg_ref, dep_ref):
    def conv_block(x, w_ref, s_ref, b_ref):
        # x: (M, Cin_f) bf16, w_ref: (Cin_f, T*Cout_f) bf16 (BN scale folded),
        # s_ref: (T, M, M) f32 one-step shift matrices, b_ref: (1|M, Cout_f) f32.
        cout = b_ref.shape[-1]
        n_taps = s_ref.shape[0]
        # Single wide-N channel matmul for all taps.
        z = jnp.dot(x, w_ref[...], preferred_element_type=jnp.float32)
        # Tiny per-tap spatial shift-and-accumulate (exact: 0/1 shift matrices).
        acc = jnp.dot(s_ref[0], z[:, 0:cout], preferred_element_type=jnp.float32)
        for t in range(1, n_taps):
            acc = acc + jnp.dot(s_ref[t], z[:, t * cout:(t + 1) * cout],
                                preferred_element_type=jnp.float32)
        y = jnp.maximum(acc + b_ref[...], 0.0)          # shift + ReLU (f32)
        return y.astype(jnp.bfloat16)

    x = x_ref[...]                                      # (M, 48) bf16, raw image
    d1 = conv_block(x, w1_ref, s1_ref, b1_ref)          # (M, 64)   16ch @ H/2
    d2 = conv_block(d1, w2_ref, s2_ref, b2_ref)         # (M, 32)   32ch @ H/4
    u1 = conv_block(d2, w3_ref, s3_ref, b3_ref)         # (M, 64)   16ch @ H/2
    u2 = conv_block(u1, w4_ref, s4_ref, b4_ref)         # (M, 256)  16ch @ H

    # Merged seg + depth 1x1 heads: one dot, sigmoid only on the depth lanes.
    y = jnp.dot(u2, wh_ref[...], preferred_element_type=jnp.float32) + bh_ref[...]
    n_seg = seg_ref.shape[-1]
    seg_ref[...] = y[:, :n_seg]
    dep_ref[...] = jax.nn.sigmoid(y[:, n_seg:])


# ---------------------------------------------------------------------------
# Host-side (trace-time) static table construction.
#
# Framing convention: a feature map with C channels at resolution (f*gh, f*gw)
# is stored as (P, f*f*C) with P = gh*gw grid pixels (p = gh_row*gw + gw_col)
# and framed channel k = (A*f + B)*C + c  (A, B = intra-cell row/col offsets).
# Stride-2 convs / transposed convs become stride-1 convs on the (gh, gw) grid.
# ---------------------------------------------------------------------------
def _frame_down_conv(w, f_in):
    """Conv2d(k=3, s=2, p=1) on an f_in-framed input -> framed taps (f_out=f_in/2)."""
    cout, cin = w.shape[0], w.shape[1]
    f_out = f_in // 2
    taps = {}
    for a in range(f_out):
        for kh in range(3):
            m = 2 * a + kh - 1
            dR, A = m // f_in, m % f_in
            for b in range(f_out):
                for kw in range(3):
                    n = 2 * b + kw - 1
                    dQ, Bp = n // f_in, n % f_in
                    wd = taps.setdefault(
                        (dR, dQ),
                        np.zeros((f_in * f_in * cin, f_out * f_out * cout), np.float64))
                    ri = (A * f_in + Bp) * cin
                    ci = (a * f_out + b) * cout
                    wd[ri:ri + cin, ci:ci + cout] += w[:, :, kh, kw].T
    tap_list = sorted(taps.keys())
    return tap_list, [taps[d] for d in tap_list]


def _frame_up_conv(w, f_in):
    """ConvTranspose2d(k=3, s=2, p=1, output_padding=1) on an f_in-framed input
    -> framed taps (f_out=2*f_in).  w has shape (Cin, Cout, 3, 3)."""
    cin, cout = w.shape[0], w.shape[1]
    f_out = 2 * f_in
    taps = {}
    for a in range(f_out):
        for kh in range(3):
            for A in range(f_in):
                mh = a + 1 - kh - 2 * A
                if mh % f_out != 0:
                    continue
                dR = mh // f_out
                for b in range(f_out):
                    for kw in range(3):
                        for Bp in range(f_in):
                            mw = b + 1 - kw - 2 * Bp
                            if mw % f_out != 0:
                                continue
                            dQ = mw // f_out
                            wd = taps.setdefault(
                                (dR, dQ),
                                np.zeros((f_in * f_in * cin, f_out * f_out * cout),
                                         np.float64))
                            ri = (A * f_in + Bp) * cin
                            ci = (a * f_out + b) * cout
                            wd[ri:ri + cin, ci:ci + cout] += w[:, :, kh, kw]
    tap_list = sorted(taps.keys())
    return tap_list, [taps[d] for d in tap_list]


def _shift_mats(tap_list, gh, gw):
    """(T, P, P) 0/1 one-step shift matrices on the (gh, gw) grid (OOB -> 0)."""
    P = gh * gw
    S = np.zeros((len(tap_list), P, P), np.float32)
    for t, (dR, dQ) in enumerate(tap_list):
        for r in range(gh):
            for q in range(gw):
                ri, qi = r + dR, q + dQ
                if 0 <= ri < gh and 0 <= qi < gw:
                    S[t, r * gw + q, ri * gw + qi] = 1.0
    return S


def _bn_affine(conv_bias, bn):
    scale = np.asarray(bn["gamma"], np.float64) / np.sqrt(
        np.asarray(bn["var"], np.float64) + BN_EPS)
    shift = (np.asarray(conv_bias, np.float64)
             - np.asarray(bn["mean"], np.float64)) * scale + np.asarray(bn["beta"],
                                                                        np.float64)
    return scale, shift


def build_tables(params, H, W, group=1):
    assert H % 4 == 0 and W % 4 == 0, "H, W must be multiples of 4"
    gh, gw = H // 4, W // 4
    P = gh * gw

    def fold_cols(wds, scale, f_out):
        col_scale = np.tile(scale, f_out * f_out)            # column = (a,b,o), o fastest
        return [wd * col_scale[None, :] for wd in wds]

    # ---- down1 (3 -> 16, stride 2), input normalization folded in -------------
    sc1, sh1 = _bn_affine(params["down1_b"], params["down1_bn"])
    taps1, wds1 = _frame_down_conv(np.asarray(params["down1_w"], np.float64), f_in=4)
    wds1 = fold_cols(wds1, sc1, f_out=2)
    S1 = _shift_mats(taps1, gh, gw)
    row_std = np.tile(INPUT_STD.astype(np.float64), 16)       # k_in = (A,B,c), c fastest
    neg_mean = np.tile(-INPUT_MEAN.astype(np.float64), 16)
    wds1 = [wd / row_std[:, None] for wd in wds1]             # fold 1/std into W
    b1_map = np.tile(np.tile(sh1, 4)[None, :], (P, 1))        # (P, 64) bias map
    for t, wd in enumerate(wds1):                             # -mean/std x zero-padding
        b1_map += np.outer(S1[t].sum(axis=1), neg_mean @ wd)
    W1 = np.concatenate(wds1, axis=1)

    # ---- down2 (16 -> 32, stride 2) --------------------------------------------
    sc2, sh2 = _bn_affine(params["down2_b"], params["down2_bn"])
    taps2, wds2 = _frame_down_conv(np.asarray(params["down2_w"], np.float64), f_in=2)
    wds2 = fold_cols(wds2, sc2, f_out=1)
    S2 = _shift_mats(taps2, gh, gw)
    W2 = np.concatenate(wds2, axis=1)
    b2 = sh2[None, :]

    # ---- up1 (32 -> 16, x2) -----------------------------------------------------
    sc3, sh3 = _bn_affine(params["up1_b"], params["up1_bn"])
    taps3, wds3 = _frame_up_conv(np.asarray(params["up1_w"], np.float64), f_in=1)
    wds3 = fold_cols(wds3, sc3, f_out=2)
    S3 = _shift_mats(taps3, gh, gw)
    W3 = np.concatenate(wds3, axis=1)
    b3 = np.tile(sh3, 4)[None, :]

    # ---- up2 (16 -> 16, x2) -----------------------------------------------------
    sc4, sh4 = _bn_affine(params["up2_b"], params["up2_bn"])
    taps4, wds4 = _frame_up_conv(np.asarray(params["up2_w"], np.float64), f_in=2)
    wds4 = fold_cols(wds4, sc4, f_out=4)
    S4 = _shift_mats(taps4, gh, gw)
    W4 = np.concatenate(wds4, axis=1)
    b4 = np.tile(sh4, 16)[None, :]

    # ---- 1x1 heads (block-diagonal in the framed channels) ---------------------
    nc = int(np.asarray(params["seg_w"]).shape[0])
    seg_w = np.asarray(params["seg_w"], np.float64).reshape(nc, 16)
    dep_w = np.asarray(params["depth_w"], np.float64).reshape(1, 16)
    Wh_seg = np.zeros((16 * 16, 16 * nc), np.float64)
    Wh_dep = np.zeros((16 * 16, 16), np.float64)
    for ab in range(16):
        Wh_seg[ab * 16:(ab + 1) * 16, ab * nc:(ab + 1) * nc] = seg_w.T
        Wh_dep[ab * 16:(ab + 1) * 16, ab:ab + 1] = dep_w.T
    Wh = np.concatenate([Wh_seg, Wh_dep], axis=1)              # (256, 16*(nc+1))
    bh = np.concatenate([np.tile(np.asarray(params["seg_b"], np.float64), 16),
                         np.tile(np.asarray(params["depth_b"], np.float64), 16)])[None, :]

    # ---- pack several images per grid step: block-diagonal shifts --------------
    if group > 1:
        eye = np.eye(group, dtype=np.float64)

        def kron_group(S):
            return np.stack([np.kron(eye, S[t]) for t in range(S.shape[0])])

        S1, S2, S3, S4 = (kron_group(s) for s in (S1, S2, S3, S4))
        b1_map = np.tile(b1_map, (group, 1))

    def wcast(a):
        return jnp.asarray(a, jnp.bfloat16)

    def fcast(a):
        return jnp.asarray(a, jnp.float32)

    return {
        "w1": wcast(W1), "s1": fcast(S1), "b1": fcast(b1_map),
        "w2": wcast(W2), "s2": fcast(S2), "b2": fcast(b2),
        "w3": wcast(W3), "s3": fcast(S3), "b3": fcast(b3),
        "w4": wcast(W4), "s4": fcast(S4), "b4": fcast(b4),
        "wh": wcast(Wh), "bh": fcast(bh),
        "gh": gh, "gw": gw, "group": group, "n_seg": 16 * nc,
    }


# ---------------------------------------------------------------------------
# Wrapper: NCHW API identical to the PyTorch module's forward().
# ---------------------------------------------------------------------------
def detector_forward(x_nchw, tables):
    B, C, H, W = x_nchw.shape
    gh, gw, group = tables["gh"], tables["gw"], tables["group"]
    P = gh * gw
    M = group * P
    assert B % group == 0, "batch must be divisible by images-per-step"
    nsteps = B // group
    n_seg = tables["n_seg"]
    nc = n_seg // 16
    kin = int(tables["w1"].shape[0])

    # Frame the input: (B,C,H,W) -> (B,P,16*C), channel k = (A*4+B)*C + c.
    xf = x_nchw.reshape(B, C, gh, 4, gw, 4)
    xf = jnp.transpose(xf, (0, 2, 4, 3, 5, 1)).reshape(B, P, 16 * C)
    xf = xf.reshape(nsteps, M, 16 * C).astype(jnp.bfloat16)

    tbl = [tables[k] for k in ("w1", "s1", "b1", "w2", "s2", "b2", "w3", "s3",
                               "b3", "w4", "s4", "b4", "wh", "bh")]

    def const_spec(a):
        zeros = (0,) * a.ndim
        return pl.BlockSpec(a.shape, lambda i, _z=zeros: _z)

    # Advisory cost estimate so XLA schedules around the custom call.
    macs = 0
    for wk, sk, bk in (("w1", "s1", "b1"), ("w2", "s2", "b2"),
                       ("w3", "s3", "b3"), ("w4", "s4", "b4")):
        k_in, n = (int(d) for d in tables[wk].shape)
        t = int(tables[sk].shape[0])
        co = int(tables[bk].shape[-1])
        macs += M * k_in * n + t * M * M * co
    macs += M * int(tables["wh"].shape[0]) * int(tables["wh"].shape[1])
    table_bytes = sum(int(tables[k].size) * tables[k].dtype.itemsize
                      for k in ("w1", "s1", "b1", "w2", "s2", "b2", "w3", "s3",
                                "b3", "w4", "s4", "b4", "wh", "bh"))
    cost = pl.CostEstimate(
        flops=2 * macs * nsteps,
        transcendentals=nsteps * M * 16,
        bytes_accessed=int(xf.size) * 2 + table_bytes + nsteps * M * (n_seg + 16) * 4,
    )

    seg_f, dep_f = pl.pallas_call(
        _detector_kernel,
        out_shape=(jax.ShapeDtypeStruct((nsteps, M, n_seg), jnp.float32),
                   jax.ShapeDtypeStruct((nsteps, M, 16), jnp.float32)),
        grid=(nsteps,),
        in_specs=[pl.BlockSpec((None, M, kin), lambda i: (i, 0, 0))]
                 + [const_spec(a) for a in tbl],
        out_specs=(pl.BlockSpec((None, M, n_seg), lambda i: (i, 0, 0)),
                   pl.BlockSpec((None, M, 16), lambda i: (i, 0, 0))),
        compiler_params=pltpu.CompilerParams(dimension_semantics=("parallel",)),
        cost_estimate=cost,
    )(xf, *tbl)

    # Un-frame on the host (cheap XLA reshapes/transposes).
    seg = seg_f.reshape(B, P, n_seg).reshape(B, gh, gw, 4, 4, nc)
    logits = jnp.transpose(seg, (0, 5, 1, 3, 2, 4)).reshape(B, nc, H, W)
    dep = dep_f.reshape(B, P, 16).reshape(B, gh, gw, 4, 4)
    depth = jnp.transpose(dep, (0, 1, 3, 2, 4)).reshape(B, H, W)
    return logits, depth


# ---------------------------------------------------------------------------
# Pure-JAX f32 reference (loose numerical self-check).
# ---------------------------------------------------------------------------
def _ref_forward(x_nchw, params):
    mean = jnp.asarray(INPUT_MEAN)
    std = jnp.asarray(INPUT_STD)
    z = (x_nchw - mean[None, :, None, None]) / std[None, :, None, None]
    z = jnp.transpose(z, (0, 2, 3, 1))  # NHWC

    def bn_relu(y, bias, bn):
        scale = bn["gamma"] / jnp.sqrt(bn["var"] + BN_EPS)
        y = y + bias
        y = (y - bn["mean"]) * scale + bn["beta"]
        return jnp.maximum(y, 0.0)

    def down(x, w, b, bn):
        w_hwio = jnp.transpose(w, (2, 3, 1, 0))
        y = lax.conv_general_dilated(
            x, w_hwio, (2, 2), [(1, 1), (1, 1)],
            dimension_numbers=("NHWC", "HWIO", "NHWC"),
            precision=lax.Precision.HIGHEST)
        return bn_relu(y, b, bn)

    def up(x, w, b, bn):
        w_hwio = jnp.transpose(w[:, :, ::-1, ::-1], (2, 3, 0, 1))
        y = lax.conv_general_dilated(
            x, w_hwio, (1, 1), [(1, 2), (1, 2)], lhs_dilation=(2, 2),
            dimension_numbers=("NHWC", "HWIO", "NHWC"),
            precision=lax.Precision.HIGHEST)
        return bn_relu(y, b, bn)

    d1 = down(z, params["down1_w"], params["down1_b"], params["down1_bn"])
    d2 = down(d1, params["down2_w"], params["down2_b"], params["down2_bn"])
    u1 = up(d2, params["up1_w"], params["up1_b"], params["up1_bn"])
    u2 = up(u1, params["up2_w"], params["up2_b"], params["up2_bn"])

    nc = params["seg_w"].shape[0]
    logits = jnp.einsum("bhwc,oc->bhwo", u2, params["seg_w"].reshape(nc, -1),
                        precision=lax.Precision.HIGHEST) + params["seg_b"]
    depth = jax.nn.sigmoid(
        jnp.einsum("bhwc,oc->bhwo", u2, params["depth_w"].reshape(1, -1),
                   precision=lax.Precision.HIGHEST) + params["depth_b"])
    return jnp.transpose(logits, (0, 3, 1, 2)), depth[..., 0]


# ---------------------------------------------------------------------------
# Deterministic synthetic parameters matching the module's shapes.
# ---------------------------------------------------------------------------
def init_params(key, in_channels=3, num_classes=3):
    ks = list(jax.random.split(key, 24))

    def conv_w(k, cout, cin, ksz):
        fan_in = cin * ksz * ksz
        return jax.random.normal(k, (cout, cin, ksz, ksz), jnp.float32) / jnp.sqrt(fan_in)

    def convT_w(k, cin, cout, ksz):
        fan_in = cin * ksz * ksz
        return jax.random.normal(k, (cin, cout, ksz, ksz), jnp.float32) / jnp.sqrt(fan_in)

    def bias(k, c):
        return 0.01 * jax.random.normal(k, (c,), jnp.float32)

    def bn(k, c):
        k1, k2, k3, k4 = jax.random.split(k, 4)
        return {
            "gamma": 1.0 + 0.1 * jax.random.normal(k1, (c,), jnp.float32),
            "beta": 0.1 * jax.random.normal(k2, (c,), jnp.float32),
            "mean": 0.05 * jax.random.normal(k3, (c,), jnp.float32),
            "var": 1.0 + 0.1 * jnp.abs(jax.random.normal(k4, (c,), jnp.float32)),
        }

    return {
        "down1_w": conv_w(ks[0], 16, in_channels, 3),
        "down1_b": bias(ks[1], 16),
        "down1_bn": bn(ks[2], 16),
        "down2_w": conv_w(ks[3], 32, 16, 3),
        "down2_b": bias(ks[4], 32),
        "down2_bn": bn(ks[5], 32),
        "up1_w": convT_w(ks[6], 32, 16, 3),
        "up1_b": bias(ks[7], 16),
        "up1_bn": bn(ks[8], 16),
        "up2_w": convT_w(ks[9], 16, 16, 3),
        "up2_b": bias(ks[10], 16),
        "up2_bn": bn(ks[11], 16),
        "seg_w": conv_w(ks[12], num_classes, 16, 1),
        "seg_b": bias(ks[13], num_classes),
        "depth_w": conv_w(ks[14], 1, 16, 1),
        "depth_b": bias(ks[15], 1),
    }


if __name__ == "__main__":
    key = jax.random.PRNGKey(0)
    k_params, k_x = jax.random.split(key)
    params = init_params(k_params, in_channels=3, num_classes=3)

    B, C, H, W = 4, 3, 16, 16
    x = jax.random.uniform(k_x, (B, C, H, W), jnp.float32)  # vals in [0, 1]

    # group=2: two images share a grid step (amortizes per-step cost on the
    # single-core v5e/v6e loop) while keeping 2 parallel grid steps so both
    # v7x TensorCores stay busy.
    tables = build_tables(params, H, W, group=2)
    fwd = jax.jit(lambda xx: detector_forward(xx, tables))
    logits, depth = fwd(x)
    jax.block_until_ready((logits, depth))

    assert logits.shape == (B, 3, H, W), logits.shape
    assert depth.shape == (B, H, W), depth.shape
    assert logits.dtype == jnp.float32 and depth.dtype == jnp.float32
    assert bool(jnp.all(jnp.isfinite(logits))) and bool(jnp.all(jnp.isfinite(depth)))
    assert bool(jnp.all((depth >= 0.0) & (depth <= 1.0)))  # sigmoid range

    # Loose numerical check vs an f32 XLA reference (kernel uses bf16 operands).
    ref_logits, ref_depth = jax.jit(lambda xx: _ref_forward(xx, params))(x)
    jax.block_until_ready((ref_logits, ref_depth))
    assert bool(jnp.allclose(logits, ref_logits, rtol=5e-2, atol=1e-1)), (
        "max |dlogits| = %f" % float(jnp.max(jnp.abs(logits - ref_logits))))
    assert bool(jnp.allclose(depth, ref_depth, rtol=5e-2, atol=1e-1)), (
        "max |ddepth| = %f" % float(jnp.max(jnp.abs(depth - ref_depth))))

    print("KERNEL_OK")
</pallas_src>

<mosaic_0001>
module attributes {stable_mosaic.version = 11 : i64} {
  func.func @_detector_kernel(%arg0: i32, %arg1: memref<1x32x48xbf16, #tpu.memory_space<vmem>>, %arg2: memref<48x256xbf16, #tpu.memory_space<vmem>>, %arg3: memref<4x32x32xf32, #tpu.memory_space<vmem>>, %arg4: memref<32x64xf32, #tpu.memory_space<vmem>>, %arg5: memref<64x128xbf16, #tpu.memory_space<vmem>>, %arg6: memref<4x32x32xf32, #tpu.memory_space<vmem>>, %arg7: memref<1x32xf32, #tpu.memory_space<vmem>>, %arg8: memref<32x256xbf16, #tpu.memory_space<vmem>>, %arg9: memref<4x32x32xf32, #tpu.memory_space<vmem>>, %arg10: memref<1x64xf32, #tpu.memory_space<vmem>>, %arg11: memref<64x1024xbf16, #tpu.memory_space<vmem>>, %arg12: memref<4x32x32xf32, #tpu.memory_space<vmem>>, %arg13: memref<1x256xf32, #tpu.memory_space<vmem>>, %arg14: memref<256x64xbf16, #tpu.memory_space<vmem>>, %arg15: memref<1x64xf32, #tpu.memory_space<vmem>>, %arg16: memref<1x32x48xf32, #tpu.memory_space<vmem>>, %arg17: memref<1x32x16xf32, #tpu.memory_space<vmem>>) attributes {dimension_semantics = [#tpu.dimension_semantics<parallel>], iteration_bounds = array<i64: 2>, scalar_prefetch = 0 : i64, scratch_operands = 0 : i64, tpu.core_type = #tpu.core_type<tc>, window_params = [{transform_indices = @transform_0, window_bounds = array<i64: 1, 32, 48>}, {pipeline_mode = #tpu.pipeline_mode<synchronous>, transform_indices = @transform_1, window_bounds = array<i64: 48, 256>}, {pipeline_mode = #tpu.pipeline_mode<synchronous>, transform_indices = @transform_2, window_bounds = array<i64: 4, 32, 32>}, {pipeline_mode = #tpu.pipeline_mode<synchronous>, transform_indices = @transform_3, window_bounds = array<i64: 32, 64>}, {pipeline_mode = #tpu.pipeline_mode<synchronous>, transform_indices = @transform_4, window_bounds = array<i64: 64, 128>}, {pipeline_mode = #tpu.pipeline_mode<synchronous>, transform_indices = @transform_5, window_bounds = array<i64: 4, 32, 32>}, {pipeline_mode = #tpu.pipeline_mode<synchronous>, transform_indices = @transform_6, window_bounds = array<i64: 1, 32>}, {pipeline_mode = #tpu.pipeline_mode<synchronous>, transform_indices = @transform_7, window_bounds = array<i64: 32, 256>}, {pipeline_mode = #tpu.pipeline_mode<synchronous>, transform_indices = @transform_8, window_bounds = array<i64: 4, 32, 32>}, {pipeline_mode = #tpu.pipeline_mode<synchronous>, transform_indices = @transform_9, window_bounds = array<i64: 1, 64>}, {pipeline_mode = #tpu.pipeline_mode<synchronous>, transform_indices = @transform_10, window_bounds = array<i64: 64, 1024>}, {pipeline_mode = #tpu.pipeline_mode<synchronous>, transform_indices = @transform_11, window_bounds = array<i64: 4, 32, 32>}, {pipeline_mode = #tpu.pipeline_mode<synchronous>, transform_indices = @transform_12, window_bounds = array<i64: 1, 256>}, {pipeline_mode = #tpu.pipeline_mode<synchronous>, transform_indices = @transform_13, window_bounds = array<i64: 256, 64>}, {pipeline_mode = #tpu.pipeline_mode<synchronous>, transform_indices = @transform_14, window_bounds = array<i64: 1, 64>}, {transform_indices = @transform_15, window_bounds = array<i64: 1, 32, 48>}, {transform_indices = @transform_16, window_bounds = array<i64: 1, 32, 16>}]} {
    %c0 = arith.constant 0 : index
    %c0_0 = arith.constant 0 : index
    %c0_1 = arith.constant 0 : index
    %0 = vector.load %arg1[%c0, %c0_0, %c0_1] : memref<1x32x48xbf16, #tpu.memory_space<vmem>>, vector<1x32x48xbf16>
    %1 = vector.shape_cast %0 : vector<1x32x48xbf16> to vector<32x48xbf16>
    %c0_2 = arith.constant 0 : index
    %c0_3 = arith.constant 0 : index
    %2 = vector.load %arg2[%c0_2, %c0_3] : memref<48x256xbf16, #tpu.memory_space<vmem>>, vector<48x256xbf16>
    %cst = arith.constant dense<0.000000e+00> : vector<32x256xf32>
    %3 = tpu.matmul %1, %2, %cst {dimension_numbers = #tpu.dot_dimension_numbers<[1], [0], [0], [1], [0, 0, 1, 1], [], []>} : vector<32x48xbf16>, vector<48x256xbf16>, vector<32x256xf32> -> vector<32x256xf32>
    %c0_4 = arith.constant 0 : index
    %c0_5 = arith.constant 0 : index
    %c0_6 = arith.constant 0 : index
    %4 = vector.load %arg3[%c0_4, %c0_5, %c0_6] : memref<4x32x32xf32, #tpu.memory_space<vmem>>, vector<1x32x32xf32>
    %5 = vector.shape_cast %4 : vector<1x32x32xf32> to vector<32x32xf32>
    %6 = vector.extract_strided_slice %3 {offsets = [0, 0], sizes = [32, 64], strides = [1, 1]} : vector<32x256xf32> to vector<32x64xf32>
    %cst_7 = arith.constant dense<0.000000e+00> : vector<32x64xf32>
    %7 = tpu.matmul %5, %6, %cst_7 {dimension_numbers = #tpu.dot_dimension_numbers<[1], [0], [0], [1], [0, 0, 1, 1], [], []>} : vector<32x32xf32>, vector<32x64xf32>, vector<32x64xf32> -> vector<32x64xf32>
    %c1 = arith.constant 1 : index
    %c0_8 = arith.constant 0 : index
    %c0_9 = arith.constant 0 : index
    %8 = vector.load %arg3[%c1, %c0_8, %c0_9] : memref<4x32x32xf32, #tpu.memory_space<vmem>>, vector<1x32x32xf32>
    %9 = vector.shape_cast %8 : vector<1x32x32xf32> to vector<32x32xf32>
    %10 = vector.extract_strided_slice %3 {offsets = [0, 64], sizes = [32, 64], strides = [1, 1]} : vector<32x256xf32> to vector<32x64xf32>
    %cst_10 = arith.constant dense<0.000000e+00> : vector<32x64xf32>
    %11 = tpu.matmul %9, %10, %cst_10 {dimension_numbers = #tpu.dot_dimension_numbers<[1], [0], [0], [1], [0, 0, 1, 1], [], []>} : vector<32x32xf32>, vector<32x64xf32>, vector<32x64xf32> -> vector<32x64xf32>
    %12 = arith.addf %7, %11 : vector<32x64xf32>
    %c2 = arith.constant 2 : index
    %c0_11 = arith.constant 0 : index
    %c0_12 = arith.constant 0 : index
    %13 = vector.load %arg3[%c2, %c0_11, %c0_12] : memref<4x32x32xf32, #tpu.memory_space<vmem>>, vector<1x32x32xf32>
    %14 = vector.shape_cast %13 : vector<1x32x32xf32> to vector<32x32xf32>
    %15 = vector.extract_strided_slice %3 {offsets = [0, 128], sizes = [32, 64], strides = [1, 1]} : vector<32x256xf32> to vector<32x64xf32>
    %cst_13 = arith.constant dense<0.000000e+00> : vector<32x64xf32>
    %16 = tpu.matmul %14, %15, %cst_13 {dimension_numbers = #tpu.dot_dimension_numbers<[1], [0], [0], [1], [0, 0, 1, 1], [], []>} : vector<32x32xf32>, vector<32x64xf32>, vector<32x64xf32> -> vector<32x64xf32>
    %17 = arith.addf %12, %16 : vector<32x64xf32>
    %c3 = arith.constant 3 : index
    %c0_14 = arith.constant 0 : index
    %c0_15 = arith.constant 0 : index
    %18 = vector.load %arg3[%c3, %c0_14, %c0_15] : memref<4x32x32xf32, #tpu.memory_space<vmem>>, vector<1x32x32xf32>
    %19 = vector.shape_cast %18 : vector<1x32x32xf32> to vector<32x32xf32>
    %20 = vector.extract_strided_slice %3 {offsets = [0, 192], sizes = [32, 64], strides = [1, 1]} : vector<32x256xf32> to vector<32x64xf32>
    %cst_16 = arith.constant dense<0.000000e+00> : vector<32x64xf32>
    %21 = tpu.matmul %19, %20, %cst_16 {dimension_numbers = #tpu.dot_dimension_numbers<[1], [0], [0], [1], [0, 0, 1, 1], [], []>} : vector<32x32xf32>, vector<32x64xf32>, vector<32x64xf32> -> vector<32x64xf32>
    %22 = arith.addf %17, %21 : vector<32x64xf32>
    %c0_17 = arith.constant 0 : index
    %c0_18 = arith.constant 0 : index
    %23 = vector.load %arg4[%c0_17, %c0_18] : memref<32x64xf32, #tpu.memory_space<vmem>>, vector<32x64xf32>
    %24 = arith.addf %22, %23 : vector<32x64xf32>
    %cst_19 = arith.constant 0.000000e+00 : f32
    %25 = vector.broadcast %cst_19 : f32 to vector<32x64xf32>
    %26 = arith.maximumf %24, %25 : vector<32x64xf32>
    %27 = arith.truncf %26 : vector<32x64xf32> to vector<32x64xbf16>
    %c0_20 = arith.constant 0 : index
    %c0_21 = arith.constant 0 : index
    %28 = vector.load %arg5[%c0_20, %c0_21] : memref<64x128xbf16, #tpu.memory_space<vmem>>, vector<64x128xbf16>
    %cst_22 = arith.constant dense<0.000000e+00> : vector<32x128xf32>
    %29 = tpu.matmul %27, %28, %cst_22 {dimension_numbers = #tpu.dot_dimension_numbers<[1], [0], [0], [1], [0, 0, 1, 1], [], []>} : vector<32x64xbf16>, vector<64x128xbf16>, vector<32x128xf32> -> vector<32x128xf32>
    %c0_23 = arith.constant 0 : index
    %c0_24 = arith.constant 0 : index
    %c0_25 = arith.constant 0 : index
    %30 = vector.load %arg6[%c0_23, %c0_24, %c0_25] : memref<4x32x32xf32, #tpu.memory_space<vmem>>, vector<1x32x32xf32>
    %31 = vector.shape_cast %30 : vector<1x32x32xf32> to vector<32x32xf32>
    %32 = vector.extract_strided_slice %29 {offsets = [0, 0], sizes = [32, 32], strides = [1, 1]} : vector<32x128xf32> to vector<32x32xf32>
    %cst_26 = arith.constant dense<0.000000e+00> : vector<32x32xf32>
    %33 = tpu.matmul %31, %32, %cst_26 {dimension_numbers = #tpu.dot_dimension_numbers<[1], [0], [0], [1], [0, 0, 1, 1], [], []>} : vector<32x32xf32>, vector<32x32xf32>, vector<32x32xf32> -> vector<32x32xf32>
    %c1_27 = arith.constant 1 : index
    %c0_28 = arith.constant 0 : index
    %c0_29 = arith.constant 0 : index
    %34 = vector.load %arg6[%c1_27, %c0_28, %c0_29] : memref<4x32x32xf32, #tpu.memory_space<vmem>>, vector<1x32x32xf32>
    %35 = vector.shape_cast %34 : vector<1x32x32xf32> to vector<32x32xf32>
    %36 = vector.extract_strided_slice %29 {offsets = [0, 32], sizes = [32, 32], strides = [1, 1]} : vector<32x128xf32> to vector<32x32xf32>
    %cst_30 = arith.constant dense<0.000000e+00> : vector<32x32xf32>
    %37 = tpu.matmul %35, %36, %cst_30 {dimension_numbers = #tpu.dot_dimension_numbers<[1], [0], [0], [1], [0, 0, 1, 1], [], []>} : vector<32x32xf32>, vector<32x32xf32>, vector<32x32xf32> -> vector<32x32xf32>
    %38 = arith.addf %33, %37 : vector<32x32xf32>
    %c2_31 = arith.constant 2 : index
    %c0_32 = arith.constant 0 : index
    %c0_33 = arith.constant 0 : index
    %39 = vector.load %arg6[%c2_31, %c0_32, %c0_33] : memref<4x32x32xf32, #tpu.memory_space<vmem>>, vector<1x32x32xf32>
    %40 = vector.shape_cast %39 : vector<1x32x32xf32> to vector<32x32xf32>
    %41 = vector.extract_strided_slice %29 {offsets = [0, 64], sizes = [32, 32], strides = [1, 1]} : vector<32x128xf32> to vector<32x32xf32>
    %cst_34 = arith.constant dense<0.000000e+00> : vector<32x32xf32>
    %42 = tpu.matmul %40, %41, %cst_34 {dimension_numbers = #tpu.dot_dimension_numbers<[1], [0], [0], [1], [0, 0, 1, 1], [], []>} : vector<32x32xf32>, vector<32x32xf32>, vector<32x32xf32> -> vector<32x32xf32>
    %43 = arith.addf %38, %42 : vector<32x32xf32>
    %c3_35 = arith.constant 3 : index
    %c0_36 = arith.constant 0 : index
    %c0_37 = arith.constant 0 : index
    %44 = vector.load %arg6[%c3_35, %c0_36, %c0_37] : memref<4x32x32xf32, #tpu.memory_space<vmem>>, vector<1x32x32xf32>
    %45 = vector.shape_cast %44 : vector<1x32x32xf32> to vector<32x32xf32>
    %46 = vector.extract_strided_slice %29 {offsets = [0, 96], sizes = [32, 32], strides = [1, 1]} : vector<32x128xf32> to vector<32x32xf32>
    %cst_38 = arith.constant dense<0.000000e+00> : vector<32x32xf32>
    %47 = tpu.matmul %45, %46, %cst_38 {dimension_numbers = #tpu.dot_dimension_numbers<[1], [0], [0], [1], [0, 0, 1, 1], [], []>} : vector<32x32xf32>, vector<32x32xf32>, vector<32x32xf32> -> vector<32x32xf32>
    %48 = arith.addf %43, %47 : vector<32x32xf32>
    %c0_39 = arith.constant 0 : index
    %c0_40 = arith.constant 0 : index
    %49 = vector.load %arg7[%c0_39, %c0_40] : memref<1x32xf32, #tpu.memory_space<vmem>>, vector<1x32xf32>
    %50 = vector.broadcast %49 : vector<1x32xf32> to vector<32x32xf32>
    %51 = arith.addf %48, %50 : vector<32x32xf32>
    %cst_41 = arith.constant 0.000000e+00 : f32
    %52 = vector.broadcast %cst_41 : f32 to vector<32x32xf32>
    %53 = arith.maximumf %51, %52 : vector<32x32xf32>
    %54 = arith.truncf %53 : vector<32x32xf32> to vector<32x32xbf16>
    %c0_42 = arith.constant 0 : index
    %c0_43 = arith.constant 0 : index
    %55 = vector.load %arg8[%c0_42, %c0_43] : memref<32x256xbf16, #tpu.memory_space<vmem>>, vector<32x256xbf16>
    %cst_44 = arith.constant dense<0.000000e+00> : vector<32x256xf32>
    %56 = tpu.matmul %54, %55, %cst_44 {dimension_numbers = #tpu.dot_dimension_numbers<[1], [0], [0], [1], [0, 0, 1, 1], [], []>} : vector<32x32xbf16>, vector<32x256xbf16>, vector<32x256xf32> -> vector<32x256xf32>
    %c0_45 = arith.constant 0 : index
    %c0_46 = arith.constant 0 : index
    %c0_47 = arith.constant 0 : index
    %57 = vector.load %arg9[%c0_45, %c0_46, %c0_47] : memref<4x32x32xf32, #tpu.memory_space<vmem>>, vector<1x32x32xf32>
    %58 = vector.shape_cast %57 : vector<1x32x32xf32> to vector<32x32xf32>
    %59 = vector.extract_strided_slice %56 {offsets = [0, 0], sizes = [32, 64], strides = [1, 1]} : vector<32x256xf32> to vector<32x64xf32>
    %cst_48 = arith.constant dense<0.000000e+00> : vector<32x64xf32>
    %60 = tpu.matmul %58, %59, %cst_48 {dimension_numbers = #tpu.dot_dimension_numbers<[1], [0], [0], [1], [0, 0, 1, 1], [], []>} : vector<32x32xf32>, vector<32x64xf32>, vector<32x64xf32> -> vector<32x64xf32>
    %c1_49 = arith.constant 1 : index
    %c0_50 = arith.constant 0 : index
    %c0_51 = arith.constant 0 : index
    %61 = vector.load %arg9[%c1_49, %c0_50, %c0_51] : memref<4x32x32xf32, #tpu.memory_space<vmem>>, vector<1x32x32xf32>
    %62 = vector.shape_cast %61 : vector<1x32x32xf32> to vector<32x32xf32>
    %63 = vector.extract_strided_slice %56 {offsets = [0, 64], sizes = [32, 64], strides = [1, 1]} : vector<32x256xf32> to vector<32x64xf32>
    %cst_52 = arith.constant dense<0.000000e+00> : vector<32x64xf32>
    %64 = tpu.matmul %62, %63, %cst_52 {dimension_numbers = #tpu.dot_dimension_numbers<[1], [0], [0], [1], [0, 0, 1, 1], [], []>} : vector<32x32xf32>, vector<32x64xf32>, vector<32x64xf32> -> vector<32x64xf32>
    %65 = arith.addf %60, %64 : vector<32x64xf32>
    %c2_53 = arith.constant 2 : index
    %c0_54 = arith.constant 0 : index
    %c0_55 = arith.constant 0 : index
    %66 = vector.load %arg9[%c2_53, %c0_54, %c0_55] : memref<4x32x32xf32, #tpu.memory_space<vmem>>, vector<1x32x32xf32>
    %67 = vector.shape_cast %66 : vector<1x32x32xf32> to vector<32x32xf32>
    %68 = vector.extract_strided_slice %56 {offsets = [0, 128], sizes = [32, 64], strides = [1, 1]} : vector<32x256xf32> to vector<32x64xf32>
    %cst_56 = arith.constant dense<0.000000e+00> : vector<32x64xf32>
    %69 = tpu.matmul %67, %68, %cst_56 {dimension_numbers = #tpu.dot_dimension_numbers<[1], [0], [0], [1], [0, 0, 1, 1], [], []>} : vector<32x32xf32>, vector<32x64xf32>, vector<32x64xf32> -> vector<32x64xf32>
    %70 = arith.addf %65, %69 : vector<32x64xf32>
    %c3_57 = arith.constant 3 : index
    %c0_58 = arith.constant 0 : index
    %c0_59 = arith.constant 0 : index
    %71 = vector.load %arg9[%c3_57, %c0_58, %c0_59] : memref<4x32x32xf32, #tpu.memory_space<vmem>>, vector<1x32x32xf32>
    %72 = vector.shape_cast %71 : vector<1x32x32xf32> to vector<32x32xf32>
    %73 = vector.extract_strided_slice %56 {offsets = [0, 192], sizes = [32, 64], strides = [1, 1]} : vector<32x256xf32> to vector<32x64xf32>
    %cst_60 = arith.constant dense<0.000000e+00> : vector<32x64xf32>
    %74 = tpu.matmul %72, %73, %cst_60 {dimension_numbers = #tpu.dot_dimension_numbers<[1], [0], [0], [1], [0, 0, 1, 1], [], []>} : vector<32x32xf32>, vector<32x64xf32>, vector<32x64xf32> -> vector<32x64xf32>
    %75 = arith.addf %70, %74 : vector<32x64xf32>
    %c0_61 = arith.constant 0 : index
    %c0_62 = arith.constant 0 : index
    %76 = vector.load %arg10[%c0_61, %c0_62] : memref<1x64xf32, #tpu.memory_space<vmem>>, vector<1x64xf32>
    %77 = vector.broadcast %76 : vector<1x64xf32> to vector<32x64xf32>
    %78 = arith.addf %75, %77 : vector<32x64xf32>
    %cst_63 = arith.constant 0.000000e+00 : f32
    %79 = vector.broadcast %cst_63 : f32 to vector<32x64xf32>
    %80 = arith.maximumf %78, %79 : vector<32x64xf32>
    %81 = arith.truncf %80 : vector<32x64xf32> to vector<32x64xbf16>
    %c0_64 = arith.constant 0 : index
    %c0_65 = arith.constant 0 : index
    %82 = vector.load %arg11[%c0_64, %c0_65] : memref<64x1024xbf16, #tpu.memory_space<vmem>>, vector<64x1024xbf16>
    %cst_66 = arith.constant dense<0.000000e+00> : vector<32x1024xf32>
    %83 = tpu.matmul %81, %82, %cst_66 {dimension_numbers = #tpu.dot_dimension_numbers<[1], [0], [0], [1], [0, 0, 1, 1], [], []>} : vector<32x64xbf16>, vector<64x1024xbf16>, vector<32x1024xf32> -> vector<32x1024xf32>
    %c0_67 = arith.constant 0 : index
    %c0_68 = arith.constant 0 : index
    %c0_69 = arith.constant 0 : index
    %84 = vector.load %arg12[%c0_67, %c0_68, %c0_69] : memref<4x32x32xf32, #tpu.memory_space<vmem>>, vector<1x32x32xf32>
    %85 = vector.shape_cast %84 : vector<1x32x32xf32> to vector<32x32xf32>
    %86 = vector.extract_strided_slice %83 {offsets = [0, 0], sizes = [32, 256], strides = [1, 1]} : vector<32x1024xf32> to vector<32x256xf32>
    %cst_70 = arith.constant dense<0.000000e+00> : vector<32x256xf32>
    %87 = tpu.matmul %85, %86, %cst_70 {dimension_numbers = #tpu.dot_dimension_numbers<[1], [0], [0], [1], [0, 0, 1, 1], [], []>} : vector<32x32xf32>, vector<32x256xf32>, vector<32x256xf32> -> vector<32x256xf32>
    %c1_71 = arith.constant 1 : index
    %c0_72 = arith.constant 0 : index
    %c0_73 = arith.constant 0 : index
    %88 = vector.load %arg12[%c1_71, %c0_72, %c0_73] : memref<4x32x32xf32, #tpu.memory_space<vmem>>, vector<1x32x32xf32>
    %89 = vector.shape_cast %88 : vector<1x32x32xf32> to vector<32x32xf32>
    %90 = vector.extract_strided_slice %83 {offsets = [0, 256], sizes = [32, 256], strides = [1, 1]} : vector<32x1024xf32> to vector<32x256xf32>
    %cst_74 = arith.constant dense<0.000000e+00> : vector<32x256xf32>
    %91 = tpu.matmul %89, %90, %cst_74 {dimension_numbers = #tpu.dot_dimension_numbers<[1], [0], [0], [1], [0, 0, 1, 1], [], []>} : vector<32x32xf32>, vector<32x256xf32>, vector<32x256xf32> -> vector<32x256xf32>
    %92 = arith.addf %87, %91 : vector<32x256xf32>
    %c2_75 = arith.constant 2 : index
    %c0_76 = arith.constant 0 : index
    %c0_77 = arith.constant 0 : index
    %93 = vector.load %arg12[%c2_75, %c0_76, %c0_77] : memref<4x32x32xf32, #tpu.memory_space<vmem>>, vector<1x32x32xf32>
    %94 = vector.shape_cast %93 : vector<1x32x32xf32> to vector<32x32xf32>
    %95 = vector.extract_strided_slice %83 {offsets = [0, 512], sizes = [32, 256], strides = [1, 1]} : vector<32x1024xf32> to vector<32x256xf32>
    %cst_78 = arith.constant dense<0.000000e+00> : vector<32x256xf32>
    %96 = tpu.matmul %94, %95, %cst_78 {dimension_numbers = #tpu.dot_dimension_numbers<[1], [0], [0], [1], [0, 0, 1, 1], [], []>} : vector<32x32xf32>, vector<32x256xf32>, vector<32x256xf32> -> vector<32x256xf32>
    %97 = arith.addf %92, %96 : vector<32x256xf32>
    %c3_79 = arith.constant 3 : index
    %c0_80 = arith.constant 0 : index
    %c0_81 = arith.constant 0 : index
    %98 = vector.load %arg12[%c3_79, %c0_80, %c0_81] : memref<4x32x32xf32, #tpu.memory_space<vmem>>, vector<1x32x32xf32>
    %99 = vector.shape_cast %98 : vector<1x32x32xf32> to vector<32x32xf32>
    %100 = vector.extract_strided_slice %83 {offsets = [0, 768], sizes = [32, 256], strides = [1, 1]} : vector<32x1024xf32> to vector<32x256xf32>
    %cst_82 = arith.constant dense<0.000000e+00> : vector<32x256xf32>
    %101 = tpu.matmul %99, %100, %cst_82 {dimension_numbers = #tpu.dot_dimension_numbers<[1], [0], [0], [1], [0, 0, 1, 1], [], []>} : vector<32x32xf32>, vector<32x256xf32>, vector<32x256xf32> -> vector<32x256xf32>
    %102 = arith.addf %97, %101 : vector<32x256xf32>
    %c0_83 = arith.constant 0 : index
    %c0_84 = arith.constant 0 : index
    %103 = vector.load %arg13[%c0_83, %c0_84] : memref<1x256xf32, #tpu.memory_space<vmem>>, vector<1x256xf32>
    %104 = vector.broadcast %103 : vector<1x256xf32> to vector<32x256xf32>
    %105 = arith.addf %102, %104 : vector<32x256xf32>
    %cst_85 = arith.constant 0.000000e+00 : f32
    %106 = vector.broadcast %cst_85 : f32 to vector<32x256xf32>
    %107 = arith.maximumf %105, %106 : vector<32x256xf32>
    %108 = arith.truncf %107 : vector<32x256xf32> to vector<32x256xbf16>
    %c0_86 = arith.constant 0 : index
    %c0_87 = arith.constant 0 : index
    %109 = vector.load %arg14[%c0_86, %c0_87] : memref<256x64xbf16, #tpu.memory_space<vmem>>, vector<256x64xbf16>
    %cst_88 = arith.constant dense<0.000000e+00> : vector<32x64xf32>
    %110 = tpu.matmul %108, %109, %cst_88 {dimension_numbers = #tpu.dot_dimension_numbers<[1], [0], [0], [1], [0, 0, 1, 1], [], []>} : vector<32x256xbf16>, vector<256x64xbf16>, vector<32x64xf32> -> vector<32x64xf32>
    %c0_89 = arith.constant 0 : index
    %c0_90 = arith.constant 0 : index
    %111 = vector.load %arg15[%c0_89, %c0_90] : memref<1x64xf32, #tpu.memory_space<vmem>>, vector<1x64xf32>
    %112 = vector.broadcast %111 : vector<1x64xf32> to vector<32x64xf32>
    %113 = arith.addf %110, %112 : vector<32x64xf32>
    %114 = vector.extract_strided_slice %113 {offsets = [0, 0], sizes = [32, 48], strides = [1, 1]} : vector<32x64xf32> to vector<32x48xf32>
    %c0_91 = arith.constant 0 : index
    %c0_92 = arith.constant 0 : index
    %c0_93 = arith.constant 0 : index
    %115 = vector.load %arg16[%c0_91, %c0_92, %c0_93] : memref<1x32x48xf32, #tpu.memory_space<vmem>>, vector<1x32x48xf32>
    %116 = vector.shape_cast %115 : vector<1x32x48xf32> to vector<32x48xf32>
    %117 = vector.shape_cast %114 : vector<32x48xf32> to vector<1x32x48xf32>
    tpu.vector_store %arg16[%c0_91, %c0_92, %c0_93], %117 {strides = array<i32>} : memref<1x32x48xf32, #tpu.memory_space<vmem>>, vector<1x32x48xf32>,
    %118 = vector.extract_strided_slice %113 {offsets = [0, 48], sizes = [32, 16], strides = [1, 1]} : vector<32x64xf32> to vector<32x16xf32>
    %119 = arith.negf %118 : vector<32x16xf32>
    %120 = math.exp %119 : vector<32x16xf32>
    %cst_94 = arith.constant 1.000000e+00 : f32
    %121 = vector.broadcast %cst_94 : f32 to vector<32x16xf32>
    %122 = arith.addf %121, %120 : vector<32x16xf32>
    %123 = arith.divf %121, %122 : vector<32x16xf32>
    %c0_95 = arith.constant 0 : index
    %c0_96 = arith.constant 0 : index
    %c0_97 = arith.constant 0 : index
    %124 = vector.load %arg17[%c0_95, %c0_96, %c0_97] : memref<1x32x16xf32, #tpu.memory_space<vmem>>, vector<1x32x16xf32>
    %125 = vector.shape_cast %124 : vector<1x32x16xf32> to vector<32x16xf32>
    %126 = vector.shape_cast %123 : vector<32x16xf32> to vector<1x32x16xf32>
    tpu.vector_store %arg17[%c0_95, %c0_96, %c0_97], %126 {strides = array<i32>} : memref<1x32x16xf32, #tpu.memory_space<vmem>>, vector<1x32x16xf32>,
    return
  }
  func.func @transform_0(%arg0: i32) -> (i32, i32, i32) {
    %c0_i32 = arith.constant 0 : i32
    %c0_i32_0 = arith.constant 0 : i32
    %c0_i32_1 = arith.constant 0 : i32
    return %arg0, %c0_i32, %c0_i32_0 : i32, i32, i32
  }
  func.func @transform_1(%arg0: i32) -> (i32, i32) {
    %c0_i32 = arith.constant 0 : i32
    %c0_i32_0 = arith.constant 0 : i32
    %c0_i32_1 = arith.constant 0 : i32
    return %c0_i32, %c0_i32_0 : i32, i32
  }
  func.func @transform_2(%arg0: i32) -> (i32, i32, i32) {
    %c0_i32 = arith.constant 0 : i32
    %c0_i32_0 = arith.constant 0 : i32
    %c0_i32_1 = arith.constant 0 : i32
    %c0_i32_2 = arith.constant 0 : i32
    return %c0_i32, %c0_i32_0, %c0_i32_1 : i32, i32, i32
  }
  func.func @transform_3(%arg0: i32) -> (i32, i32) {
    %c0_i32 = arith.constant 0 : i32
    %c0_i32_0 = arith.constant 0 : i32
    %c0_i32_1 = arith.constant 0 : i32
    return %c0_i32, %c0_i32_0 : i32, i32
  }
  func.func @transform_4(%arg0: i32) -> (i32, i32) {
    %c0_i32 = arith.constant 0 : i32
    %c0_i32_0 = arith.constant 0 : i32
    %c0_i32_1 = arith.constant 0 : i32
    return %c0_i32, %c0_i32_0 : i32, i32
  }
  func.func @transform_5(%arg0: i32) -> (i32, i32, i32) {
    %c0_i32 = arith.constant 0 : i32
    %c0_i32_0 = arith.constant 0 : i32
    %c0_i32_1 = arith.constant 0 : i32
    %c0_i32_2 = arith.constant 0 : i32
    return %c0_i32, %c0_i32_0, %c0_i32_1 : i32, i32, i32
  }
  func.func @transform_6(%arg0: i32) -> (i32, i32) {
    %c0_i32 = arith.constant 0 : i32
    %c0_i32_0 = arith.constant 0 : i32
    %c0_i32_1 = arith.constant 0 : i32
    return %c0_i32, %c0_i32_0 : i32, i32
  }
  func.func @transform_7(%arg0: i32) -> (i32, i32) {
    %c0_i32 = arith.constant 0 : i32
    %c0_i32_0 = arith.constant 0 : i32
    %c0_i32_1 = arith.constant 0 : i32
    return %c0_i32, %c0_i32_0 : i32, i32
  }
  func.func @transform_8(%arg0: i32) -> (i32, i32, i32) {
    %c0_i32 = arith.constant 0 : i32
    %c0_i32_0 = arith.constant 0 : i32
    %c0_i32_1 = arith.constant 0 : i32
    %c0_i32_2 = arith.constant 0 : i32
    return %c0_i32, %c0_i32_0, %c0_i32_1 : i32, i32, i32
  }
  func.func @transform_9(%arg0: i32) -> (i32, i32) {
    %c0_i32 = arith.constant 0 : i32
    %c0_i32_0 = arith.constant 0 : i32
    %c0_i32_1 = arith.constant 0 : i32
    return %c0_i32, %c0_i32_0 : i32, i32
  }
  func.func @transform_10(%arg0: i32) -> (i32, i32) {
    %c0_i32 = arith.constant 0 : i32
    %c0_i32_0 = arith.constant 0 : i32
    %c0_i32_1 = arith.constant 0 : i32
    return %c0_i32, %c0_i32_0 : i32, i32
  }
  func.func @transform_11(%arg0: i32) -> (i32, i32, i32) {
    %c0_i32 = arith.constant 0 : i32
    %c0_i32_0 = arith.constant 0 : i32
    %c0_i32_1 = arith.constant 0 : i32
    %c0_i32_2 = arith.constant 0 : i32
    return %c0_i32, %c0_i32_0, %c0_i32_1 : i32, i32, i32
  }
  func.func @transform_12(%arg0: i32) -> (i32, i32) {
    %c0_i32 = arith.constant 0 : i32
    %c0_i32_0 = arith.constant 0 : i32
    %c0_i32_1 = arith.constant 0 : i32
    return %c0_i32, %c0_i32_0 : i32, i32
  }
  func.func @transform_13(%arg0: i32) -> (i32, i32) {
    %c0_i32 = arith.constant 0 : i32
    %c0_i32_0 = arith.constant 0 : i32
    %c0_i32_1 = arith.constant 0 : i32
    return %c0_i32, %c0_i32_0 : i32, i32
  }
  func.func @transform_14(%arg0: i32) -> (i32, i32) {
    %c0_i32 = arith.constant 0 : i32
    %c0_i32_0 = arith.constant 0 : i32
    %c0_i32_1 = arith.constant 0 : i32
    return %c0_i32, %c0_i32_0 : i32, i32
  }
  func.func @transform_15(%arg0: i32) -> (i32, i32, i32) {
    %c0_i32 = arith.constant 0 : i32
    %c0_i32_0 = arith.constant 0 : i32
    %c0_i32_1 = arith.constant 0 : i32
    return %arg0, %c0_i32, %c0_i32_0 : i32, i32, i32
  }
  func.func @transform_16(%arg0: i32) -> (i32, i32, i32) {
    %c0_i32 = arith.constant 0 : i32
    %c0_i32_0 = arith.constant 0 : i32
    %c0_i32_1 = arith.constant 0 : i32
    return %arg0, %c0_i32, %c0_i32_0 : i32, i32, i32
  }
}

</mosaic_0001>

<bundles_post_ra>
// kernel: _lambda_.1
= control target key start
LH: loop header
LB: loop body
LE: loop exit
PB: predicated region body
PF: predicated region fallthrough
CT: control target
= control target key end

     0   :  { %s4106_s21 = smov 0   ;;  %s4692_s0 = inlined_call_operand.vmem [shape: bf16[2,32,48], index: 0, kind: input, shape index: {}]   ;;  %s4693_s1 = inlined_call_operand.vmem [shape: bf16[48,256], index: 1, kind: input, shape index: {}]   ;;  %s4694_s2 = inlined_call_operand.vmem [shape: f32[4,32,32], index: 2, kind: input, shape index: {}, may-alias: {2,5}]   ;;  %s4695_s3 = inlined_call_operand.vmem [shape: f32[32,64], index: 3, kind: input, shape index: {}]   ;;  %s4696_s4 = inlined_call_operand.vmem [shape: bf16[64,128], index: 4, kind: input, shape index: {}]   ;;  %s4697_s5 = inlined_call_operand.vmem [shape: f32[4,32,32], index: 5, kind: input, shape index: {}, may-alias: {2,5}]   ;;  %s4698_s6 = inlined_call_operand.vmem [shape: f32[1,32], index: 6, kind: input, shape index: {}]   ;;  %s4699_s7 = inlined_call_operand.vmem [shape: bf16[32,256], index: 7, kind: input, shape index: {}]   ;;  %s4700_s8 = inlined_call_operand.vmem [shape: f32[4,32,32], index: 8, kind: input, shape index: {}, may-alias: {8,11}]   ;;  %s4701_s9 = inlined_call_operand.vmem [shape: f32[1,64], index: 9, kind: input, shape index: {}]   ;;  %s4702_s10 = inlined_call_operand.vmem [shape: bf16[64,1024], index: 10, kind: input, shape index: {}]   ;;  %s4703_s11 = inlined_call_operand.vmem [shape: f32[4,32,32], index: 11, kind: input, shape index: {}, may-alias: {8,11}]   ;;  %s4704_s12 = inlined_call_operand.vmem [shape: f32[1,256], index: 12, kind: input, shape index: {}]   ;;  %s4705_s13 = inlined_call_operand.vmem [shape: bf16[256,64], index: 13, kind: input, shape index: {}]   ;;  %s4706_s14 = inlined_call_operand.vmem [shape: f32[1,64], index: 14, kind: input, shape index: {}]   ;;  %s4707_s15 = inlined_call_operand.vmem [shape: f32[2,32,48], index: 15, kind: output, shape index: {0}]   ;;  %s4708_s16 = inlined_call_operand.vmem [shape: f32[2,32,16], index: 16, kind: output, shape index: {1}]  }
   0x1   :  { %4709 = sst [smem:[#allocation2_spill]] %s4692_s0 }
   0x2 LB: > { %s3417_s22 = sadd.s32 4294967295, %s4013_s21   ;;  %p3421_p0 = scmp.ge.s32.totalorder %s4013_s21, 1  ;;  %s4013_s21 = sphi %s4106_s21, %s27_s21  }
   0x3   : > { %p465_p1 = scmp.lt.s32.totalorder %s4013_s21, 3 }
   0x5   : > { %p466_p2 = pnand %p3421_p0, %p465_p1 }
   0x6   : > { %p520_p3 = scmp.lt.s32.totalorder (!%p466_p2), %s3417_s22, 1  ;;  %s4710_s23 = sld [smem:[#allocation2_spill]] (!%p466_p2) }
   0x7   : > { %469 = sbr.rel (%p466_p2) target bundleno = 2480 (0x9b0), region = 80  ;;  %s4016_s27 = smov (!%p466_p2), 64  }
   0x8   : > { %s4017_s30 = smov (!%p466_p2), 96  }
   0xc   : > { %v3954_v0 = vld [vmem:[%s4693_s1 + $0x24] ss:$8 sps:$4 sm:$0xff]   ;;  %v3956_v1 = vld [vmem:[%s4693_s1 + $0x20] ss:$8 sps:$4 sm:$0xff]   ;;  %v4015_v2 = vmov 0   ;;  %s4712_s22 = smov (!%p520_p3, %s3417_s22), 1 }
   0xd   : > { %625 = vmatprep.mubr.bf16.mxu0 %v4015_v2  ;;  %603 = vmatprep.subr.bf16.mxu0 %v3954_v0  ;;  %v3957_v3 = vld [vmem:[%s4693_s1 + $0x14] ss:$8 sps:$4 sm:$0xff]   ;;  %v3959_v4 = vld [vmem:[%s4693_s1 + $0x10] ss:$8 sps:$4 sm:$0xff]   ;;  %v3960_v5 = vld [vmem:[%s4693_s1 + $0x4] ss:$8 sps:$4 sm:$0xff]  }
   0xe   : > { %604 = vmatpush1.bf16.msra.mxu0 %v3956_v1  ;;  %s3627_s18 = sshll.u32 %s4712_s22, 4  ;;  %v3962_v6 = vld [vmem:[%s4693_s1] ss:$8 sps:$4 sm:$0xff]   ;;  %vm586_vm0 = vcmask 392192   ;;  %vm671_vm1 = vcmask 261120   ;;  %v3440_v26 = vld [vmem:[%s4694_s2 + $0x30] sm:$0xff] }
   0xf   : > { %605 = vmatprep.subr.bf16.mxu0 %v3957_v3  ;;  %s524_s24 = scalar_lea.vmem %s4710_s23, %s3627_s18  ;;  %v3438_v14 = vld [vmem:[%s4694_s2 + $0x20] sm:$0xff]  ;;  %v3439_v24 = vld [vmem:[%s4694_s2 + $0x28] sm:$0xff]  ;;  %v3441_v28 = vld [vmem:[%s4694_s2 + $0x38] sm:$0xff]  ;;  %vm1140_vm2 = vcmask 523264   ;;  %s4018_s18 = smov 32   ;;  %vm3324_vm3 = vcmask 130048  }
  0x10   : > { %v3963_v7 = vld [vmem:[%s524_s24] sm:$0xff]   ;;  %v3964_v8 = vld [vmem:[%s524_s24 + $0x8] sm:$0xff]   ;;  %3768 = vmatprep.mubr.msk.f32.mxu1 %vm671_vm1, %v3438_v14  ;;  %v648_v32 = vld [vmem:[%s4694_s2 + $0x10] sm:$0xff]  ;;  %s3628_s0 = sshll.u32 %s4712_s22, 5  ;;  %s4020_s24 = smov 80  }
  0x11   : > { %v3458_v18 = vld [vmem:[%s4694_s2 + $0x60] sm:$0xff]  ;;  %v647_v31 = vld [vmem:[%s4694_s2 + $0x8] sm:$0xff]  ;;  %v3460_v34 = vld [vmem:[%s4694_s2 + $0x70] sm:$0xff]  ;;  %s529_s23 = scalar_lea.vmem %s4707_s15, %s3628_s0  ;;  %s534_s28 = scalar_lea.vmem %s4708_s16, %s3628_s0 }
  0x12   : > { %606 = vmatpush1.bf16.msra.mxu0 %v3959_v4  ;;  %v646_v30 = vld [vmem:[%s4694_s2] sm:$0xff]  ;;  %v3459_v33 = vld [vmem:[%s4694_s2 + $0x68] sm:$0xff]  ;;  %v649_v35 = vld [vmem:[%s4694_s2 + $0x18] sm:$0xff] }
  0x13   : > { %607 = vmatprep.subr.bf16.mxu0 %v3960_v5  ;;  %v3450_v36 = vld [vmem:[%s4694_s2 + $0x40] sm:$0xff]  ;;  %v3461_v37 = vld [vmem:[%s4694_s2 + $0x78] sm:$0xff]  ;;  %v3451_v38 = vld [vmem:[%s4694_s2 + $0x48] sm:$0xff] }
  0x14   : > { %v3452_v39 = vld [vmem:[%s4694_s2 + $0x50] sm:$0xff]  ;;  %v3453_v40 = vld [vmem:[%s4694_s2 + $0x58] sm:$0xff]  ;;  %v3967_v43 = vld [vmem:[%s4696_s4 + $0x8] sm:$0xff]  }
  0x15   : > { %v3965_v41 = vld [vmem:[%s4696_s4 + $0x18] sm:$0xff]   ;;  %v3966_v42 = vld [vmem:[%s4696_s4 + $0x10] sm:$0xff]   ;;  %v3968_v44 = vld [vmem:[%s4696_s4] sm:$0xff]  }
  0x16   : > { %608 = vmatpush1.bf16.msra.mxu0 %v3962_v6  ;;  %v1095_v59 = vld [vmem:[%s4695_s3 + $0x8] sm:$0xff]  ;;  %v1094_v0 = vld [vmem:[%s4695_s3] sm:$0xff]  ;;  %v1096_v14 = vld [vmem:[%s4695_s3 + $0x10] sm:$0xff] }
  0x19   : > { %3436 = vmatmul.mubr.msk.bf16.vlgmr.msra.gmra.mxu0 %vm586_vm0, %v3963_v7 }
  0x1a   : > { %635 = vmatprep.mubr.bf16.mxu0 %v4015_v2 }
  0x21   : > { %3437 = vmatmul.mubr.msk.bf16.gmra.mxu0 %vm586_vm0, %v3964_v8  ;;  %v1097_v8 = vld [vmem:[%s4695_s3 + $0x18] sm:$0xff] }
  0x22   : > { %3810 = vmatprep.mubr.msk.f32.mxu0 %vm671_vm1, %v3458_v18 }
  0xd9   : > { %v627_v9 = vpop.f32.mrf.mxu0 }
  0xdb   : > { %v4142_v10 = vpop.f32.mrf.mxu0 }
  0xdd   : > { %v631_v11 = vpop.f32.mrf.mxu0 }
  0xde   : > { %661 = vrot.lane.b32.xlu1 %v631_v11, %s4016_s27 }
  0xdf   : > { %v4145_v12 = vpop.f32.mrf.mxu0 }
  0xe1   : > { %v637_v13 = vpop.f32.mrf.mxu0 }
  0xe2   : > { %659 = vrot.lane.b32.xlu1 %v627_v9, %s4016_s27 }
  0xe3   : > { %v4152_v15 = vpop.f32.mrf.mxu0 }
  0xe5   : > { %v641_v16 = vpop.f32.mrf.mxu0 }
  0xe6   : > { %985 = vrot.lane.b32.xlu1 %v4152_v15, %s4016_s27  ;;  %665 = vrot.lane.b32.xlu0 %v641_v16, %s4016_s27 }
  0xe7   : > { %v643_v17 = vpop.f32.mrf.mxu0 }
  0xea   : > { %981 = vrot.lane.b32.xlu1 %v4142_v10, %s4016_s27  ;;  %663 = vrot.lane.b32.xlu0 %v637_v13, %s4016_s27 }
  0xee   : > { %987 = vrot.lane.b32.xlu0 %v643_v17, %s4016_s27 }
  0xf2   : > { %983 = vrot.lane.b32.xlu0 %v4145_v12, %s4016_s27 }
 0x150   : > { %v662_v19 = vpop.permute.xlu1 %661 }
 0x154   : > { %v660_v21 = vpop.permute.xlu1 %659 }
 0x158   : > { %v666_v20 = vpop.permute.xlu0 %665  ;;  %v986_v25 = vpop.permute.xlu1 %985 }
 0x159   : > { %3760 = vmatprep.subr.mxu1 %v666_v20 }
 0x15a   : > { %3761 = vmatpush3.msra.mxu1 %v666_v20 }
 0x15c   : > { %v664_v22 = vpop.permute.xlu0 %663  ;;  %v982_v29 = vpop.permute.xlu1 %981 }
 0x15d   : > { %3762 = vmatprep.subr.mxu1 %v664_v22 }
 0x15e   : > { %3763 = vmatpush3.msra.mxu1 %v664_v22 }
 0x15f   : > { %3764 = vmatprep.subr.mxu1 %v662_v19 }
 0x160   : > { %3765 = vmatpush3.msra.mxu1 %v662_v19  ;;  %v988_v23 = vpop.permute.xlu0 %987 }
 0x161   : > { %3766 = vmatprep.subr.mxu1 %v660_v21  ;;  %3802 = vmatprep.subr.mxu0 %v988_v23 }
 0x162   : > { %3767 = vmatpush3.msra.mxu1 %v660_v21  ;;  %3803 = vmatpush3.msra.mxu0 %v988_v23 }
 0x163   : > { %3769 = vmatmul.mubr.msk.f32.vlgmr.msra.gmra.mxu1 %vm671_vm1, %v3439_v24  ;;  %3774 = vmatprep.subr.mxu1 %v641_v16  ;;  %v3472_v24 = vld [vmem:[%s4697_s5 + $0x20] sm:$0xff] }
 0x164   : > { %3804 = vmatprep.subr.mxu0 %v986_v25  ;;  %3775 = vmatpush3.msra.mxu1 %v641_v16  ;;  %v984_v27 = vpop.permute.xlu0 %983 }
 0x165   : > { %3805 = vmatpush3.msra.mxu0 %v986_v25  ;;  %3776 = vmatprep.subr.mxu1 %v637_v13 }
 0x166   : > { %3806 = vmatprep.subr.mxu0 %v984_v27  ;;  %3771 = vmatprep.mubr.msk.f32.mxu1 %vm671_vm1, %v3440_v26 }
 0x167   : > { %3777 = vmatpush3.msra.mxu1 %v637_v13  ;;  %3807 = vmatpush3.msra.mxu0 %v984_v27 }
 0x168   : > { %3772 = vmatmul.mubr.msk.f32.gmra.mxu1 %vm671_vm1, %v3441_v28  ;;  %3778 = vmatprep.subr.mxu1 %v631_v11 }
 0x169   : > { %3808 = vmatprep.subr.mxu0 %v982_v29  ;;  %3779 = vmatpush3.msra.mxu1 %v631_v11 }
 0x16a   : > { %3809 = vmatpush3.msra.mxu0 %v982_v29  ;;  %3780 = vmatprep.subr.mxu1 %v627_v9  ;;  %v3484_v29 = vld [vmem:[%s4697_s5 + $0x40] sm:$0xff] }
 0x16b   : > { %3781 = vmatpush3.msra.mxu1 %v627_v9  ;;  %3782 = vmatprep.mubr.msk.f32.mxu1 %vm671_vm1, %v646_v30 }
 0x16c   : > { %3783 = vmatmul.mubr.msk.f32.vlgmr.msra.gmra.mxu1 %vm671_vm1, %v647_v31  ;;  %3788 = vmatprep.subr.mxu1 %v643_v17 }
 0x16d   : > { %3789 = vmatpush3.msra.mxu1 %v643_v17  ;;  %3785 = vmatprep.mubr.msk.f32.mxu1 %vm671_vm1, %v648_v32 }
 0x16e   : > { %3790 = vmatprep.subr.mxu1 %v4152_v15  ;;  %3811 = vmatmul.mubr.msk.f32.vlgmr.msra.gmra.mxu0 %vm671_vm1, %v3459_v33 }
 0x16f   : > { %3791 = vmatpush3.msra.mxu1 %v4152_v15  ;;  %3813 = vmatprep.mubr.msk.f32.mxu0 %vm671_vm1, %v3460_v34 }
 0x170   : > { %3786 = vmatmul.mubr.msk.f32.gmra.mxu1 %vm671_vm1, %v649_v35  ;;  %3792 = vmatprep.subr.mxu1 %v4145_v12  ;;  %v3473_v35 = vld [vmem:[%s4697_s5 + $0x28] sm:$0xff] }
 0x171   : > { %3793 = vmatpush3.msra.mxu1 %v4145_v12  ;;  %3796 = vmatprep.mubr.msk.f32.mxu1 %vm671_vm1, %v3450_v36 }
 0x172   : > { %3794 = vmatprep.subr.mxu1 %v4142_v10  ;;  %3814 = vmatmul.mubr.msk.f32.gmra.mxu0 %vm671_vm1, %v3461_v37 }
 0x173   : > { %3795 = vmatpush3.msra.mxu1 %v4142_v10  ;;  %3836 = vmatprep.mubr.msk.f32.mxu0 %vm671_vm1, %v3472_v24 }
 0x174   : > { %3797 = vmatmul.mubr.msk.f32.vlgmr.msra.gmra.mxu1 %vm671_vm1, %v3451_v38  ;;  %3816 = vmatprep.subr.bf16.mxu1 %v3965_v41  ;;  %v3474_v38 = vld [vmem:[%s4697_s5 + $0x30] sm:$0xff] }
 0x175   : > { %3799 = vmatprep.mubr.msk.f32.mxu1 %vm671_vm1, %v3452_v39  ;;  %3817 = vmatpush3.bf16.msra.mxu1 %v3965_v41  ;;  %v3475_v39 = vld [vmem:[%s4697_s5 + $0x38] sm:$0xff] }
 0x176   : > { %3818 = vmatprep.subr.bf16.mxu1 %v3966_v42 }
 0x178   : > { %3800 = vmatmul.mubr.msk.f32.gmra.mxu1 %vm671_vm1, %v3453_v40 }
 0x179   : > { %3819 = vmatpush3.bf16.msra.mxu1 %v3966_v42  ;;  %v1196_v42 = vld [vmem:[%s4697_s5] sm:$0xff] }
 0x17a   : > { %3820 = vmatprep.subr.bf16.mxu1 %v3967_v43 }
 0x17d   : > { %3821 = vmatpush3.bf16.msra.mxu1 %v3967_v43 }
 0x17e   : > { %3822 = vmatprep.subr.bf16.mxu1 %v3968_v44 }
 0x181   : > { %3823 = vmatpush3.bf16.msra.mxu1 %v3968_v44  ;;  %v1197_v44 = vld [vmem:[%s4697_s5 + $0x8] sm:$0xff] }
 0x223   : > { %v3770_v45 = vpop.f32.mrf.mxu1 }
 0x225   : > { %v750_v46 = vpop.f32.mrf.mxu1 }
 0x228   : > { %v3773_v47 = vpop.f32.mrf.mxu1 }
 0x22a   : > { %v760_v48 = vpop.f32.mrf.mxu1 }
 0x22c   : > { %v3784_v49 = vpop.f32.mrf.mxu1 }
 0x22d   : > { %v853_v54 = vadd.f32 %v3784_v49, %v3770_v45  ;;  %v3485_v45 = vld [vmem:[%s4697_s5 + $0x48] sm:$0xff]  ;;  %v1199_v49 = vld [vmem:[%s4697_s5 + $0x18] sm:$0xff] }
 0x22e   : > { %v847_v50 = vpop.f32.mrf.mxu1  ;;  %v3812_v52 = vpop.f32.mrf.mxu0 }
 0x22f   : > { %v848_v57 = vadd.f32 %v847_v50, %v750_v46  ;;  %v1198_v46 = vld [vmem:[%s4697_s5 + $0x10] sm:$0xff]  ;;  %v3487_v50 = vld [vmem:[%s4697_s5 + $0x58] sm:$0xff] }
 0x230   : > { %v3787_v51 = vpop.f32.mrf.mxu1  ;;  %v1071_v56 = vpop.f32.mrf.mxu0 }
 0x231   : > { %v863_v61 = vadd.f32 %v3787_v51, %v3773_v47  ;;  %v3486_v47 = vld [vmem:[%s4697_s5 + $0x50] sm:$0xff]  ;;  %v3492_v51 = vld [vmem:[%s4697_s5 + $0x60] sm:$0xff] }
 0x232   : > { %v857_v53 = vpop.f32.mrf.mxu1  ;;  %v3815_v3 = vpop.f32.mrf.mxu0 }
 0x233   : > { %v858_v4 = vadd.f32 %v857_v53, %v760_v48  ;;  %v3493_v53 = vld [vmem:[%s4697_s5 + $0x68] sm:$0xff] }
 0x234   : > { %v3798_v55 = vpop.f32.mrf.mxu1  ;;  %v1081_v13 = vpop.f32.mrf.mxu0 }
 0x235   : > { %v969_v58 = vadd.f32 %v3798_v55, %v853_v54  ;;  %v3494_v54 = vld [vmem:[%s4697_s5 + $0x70] sm:$0xff]  ;;  %v3495_v55 = vld [vmem:[%s4697_s5 + $0x78] sm:$0xff] }
 0x236   : > { %v949_v60 = vpop.f32.mrf.mxu1 }
 0x237   : > { %v1091_v62 = vadd.f32 %v3812_v52, %v969_v58  ;;  %v968_v63 = vadd.f32 %v949_v60, %v848_v57  ;;  %v3969_v57 = vld [vmem:[%s4699_s7 + $0x10] ss:$8 sps:$4 sm:$0xff]   ;;  %v3974_v58 = vld [vmem:[%s4699_s7 + $0x4] ss:$8 sps:$4 sm:$0xff]  }
 0x238   : > { %v3801_v1 = vpop.f32.mrf.mxu1 }
 0x239   : > { %v1099_v5 = vadd.f32 %v1095_v59, %v1091_v62  ;;  %v1090_v6 = vadd.f32 %v1071_v56, %v968_v63  ;;  %v971_v7 = vadd.f32 %v3801_v1, %v863_v61  ;;  %v3971_v56 = vld [vmem:[%s4699_s7 + $0x14] ss:$8 sps:$4 sm:$0xff]   ;;  %v3972_v59 = vld [vmem:[%s4699_s7] ss:$8 sps:$4 sm:$0xff]  }
 0x23a   : > { %v959_v9 = vpop.f32.mrf.mxu1 }
 0x23b   : > { %v1098_v10 = vadd.f32 %v1094_v0, %v1090_v6  ;;  %v1093_v11 = vadd.f32 %v3815_v3, %v971_v7  ;;  %v970_v12 = vadd.f32 %v959_v9, %v858_v4  ;;  %v1103_v15 = vmax.f32 %v1099_v5, 0.0 }
 0x23d   : > { %v1102_v16 = vmax.f32 %v1098_v10, 0.0  ;;  %v1101_v17 = vadd.f32 %v1097_v8, %v1093_v11  ;;  %v1092_v18 = vadd.f32 %v1081_v13, %v970_v12  ;;  %v3500_v12 = vld [vmem:[%s4698_s6] ss:$0 sm:$0xff] }
 0x23f   : > { %v1106_v19 = vpack.c.bf16 %v1103_v15, %v1102_v16  ;;  %v1100_v20 = vadd.f32 %v1096_v14, %v1092_v18  ;;  %v1105_v21 = vmax.f32 %v1101_v17, 0.0 }
 0x241   : > { %v1104_v22 = vmax.f32 %v1100_v20, 0.0  ;;  %3824 = vmatprep.mubr.msk.bf16.mxu1 %vm1140_vm2, %v1106_v19 }
 0x243   : > { %v1107_v23 = vpack.c.bf16 %v1105_v21, %v1104_v22 }
 0x245   : > { %3825 = vmatmul.mubr.msk.bf16.vlgmr.msra.gmra.mxu1 %vm1140_vm2, %v1107_v23 }
 0x246   : > { %3864 = vmatprep.mubr.msk.f32.mxu1 %vm671_vm1, %v3484_v29 }
 0x305   : > { %v3826_v25 = vpop.f32.mrf.mxu1 }
 0x306   : > { %1213 = vrot.lane.b32.xlu1 %v3826_v25, %s4017_s30 }
 0x307   : > { %v1181_v26 = vpop.f32.mrf.mxu1 }
 0x309   : > { %v3827_v27 = vpop.f32.mrf.mxu1 }
 0x30a   : > { %1209 = vrot.lane.b32.xlu1 %v1181_v26, %s4017_s30  ;;  %1215 = vrot.lane.b32.xlu0 %v3827_v27, %s4017_s30 }
 0x30b   : > { %v1184_v28 = vpop.f32.mrf.mxu1 }
 0x30e   : > { %1424 = vrot.lane.b32.xlu1 %v3826_v25, %s4016_s27  ;;  %1211 = vrot.lane.b32.xlu0 %v1184_v28, %s4017_s30 }
 0x312   : > { %1420 = vrot.lane.b32.xlu1 %v1181_v26, %s4016_s27  ;;  %1426 = vrot.lane.b32.xlu0 %v3827_v27, %s4016_s27 }
 0x316   : > { %1422 = vrot.lane.b32.xlu1 %v1184_v28, %s4016_s27  ;;  %1544 = vrot.lane.b32.xlu0 %v3827_v27, %s4018_s18 }
 0x31a   : > { %1538 = vrot.lane.b32.xlu1 %v1181_v26, %s4018_s18  ;;  %1542 = vrot.lane.b32.xlu0 %v3826_v25, %s4018_s18 }
 0x31e   : > { %1540 = vrot.lane.b32.xlu0 %v1184_v28, %s4018_s18 }
 0x378   : > { %v1214_v30 = vpop.permute.xlu1 %1213 }
 0x37c   : > { %v1210_v31 = vpop.permute.xlu1 %1209  ;;  %v1216_v32 = vpop.permute.xlu0 %1215 }
 0x37d   : > { %3828 = vmatprep.subr.mxu0 %v1216_v32 }
 0x37e   : > { %3829 = vmatpush3.msra.mxu0 %v1216_v32 }
 0x37f   : > { %3830 = vmatprep.subr.mxu0 %v1214_v30 }
 0x380   : > { %v1425_v33 = vpop.permute.xlu1 %1424  ;;  %3831 = vmatpush3.msra.mxu0 %v1214_v30  ;;  %v1212_v34 = vpop.permute.xlu0 %1211 }
 0x381   : > { %3832 = vmatprep.subr.mxu0 %v1212_v34 }
 0x382   : > { %3833 = vmatpush3.msra.mxu0 %v1212_v34 }
 0x383   : > { %3834 = vmatprep.subr.mxu0 %v1210_v31 }
 0x384   : > { %v1421_v36 = vpop.permute.xlu1 %1420  ;;  %3835 = vmatpush3.msra.mxu0 %v1210_v31  ;;  %v1427_v37 = vpop.permute.xlu0 %1426 }
 0x385   : > { %3837 = vmatmul.mubr.msk.f32.vlgmr.msra.gmra.mxu0 %vm671_vm1, %v3473_v35  ;;  %3842 = vmatprep.subr.mxu0 %v3827_v27 }
 0x386   : > { %3856 = vmatprep.subr.mxu1 %v1427_v37  ;;  %3843 = vmatpush3.msra.mxu0 %v3827_v27 }
 0x387   : > { %3857 = vmatpush3.msra.mxu1 %v1427_v37  ;;  %3844 = vmatprep.subr.mxu0 %v3826_v25 }
 0x388   : > { %3858 = vmatprep.subr.mxu1 %v1425_v33  ;;  %v1423_v40 = vpop.permute.xlu1 %1422  ;;  %3839 = vmatprep.mubr.msk.f32.mxu0 %vm671_vm1, %v3474_v38  ;;  %v1545_v41 = vpop.permute.xlu0 %1544 }
 0x389   : > { %3845 = vmatpush3.msra.mxu0 %v3826_v25  ;;  %3859 = vmatpush3.msra.mxu1 %v1425_v33 }
 0x38a   : > { %3840 = vmatmul.mubr.msk.f32.gmra.mxu0 %vm671_vm1, %v3475_v39  ;;  %3846 = vmatprep.subr.mxu0 %v1184_v28 }
 0x38b   : > { %3860 = vmatprep.subr.mxu1 %v1423_v40  ;;  %3847 = vmatpush3.msra.mxu0 %v1184_v28 }
 0x38c   : > { %3861 = vmatpush3.msra.mxu1 %v1423_v40  ;;  %3848 = vmatprep.subr.mxu0 %v1181_v26  ;;  %v1543_v43 = vpop.permute.xlu0 %1542  ;;  %v1539_v52 = vpop.permute.xlu1 %1538  ;;  %v3507_v40 = vld [vmem:[%s4700_s8 + $0x20] sm:$0xff] }
 0x38d   : > { %3862 = vmatprep.subr.mxu1 %v1421_v36  ;;  %3849 = vmatpush3.msra.mxu0 %v1181_v26 }
 0x38e   : > { %3850 = vmatprep.mubr.msk.f32.mxu0 %vm671_vm1, %v1196_v42  ;;  %3863 = vmatpush3.msra.mxu1 %v1421_v36 }
 0x38f   : > { %3851 = vmatmul.mubr.msk.f32.vlgmr.msra.gmra.mxu0 %vm671_vm1, %v1197_v44  ;;  %3870 = vmatprep.subr.mxu0 %v1545_v41 }
 0x390   : > { %3871 = vmatpush3.msra.mxu0 %v1545_v41  ;;  %3865 = vmatmul.mubr.msk.f32.vlgmr.msra.gmra.mxu1 %vm671_vm1, %v3485_v45  ;;  %v1541_v48 = vpop.permute.xlu0 %1540 }
 0x391   : > { %3872 = vmatprep.subr.mxu0 %v1543_v43  ;;  %3853 = vmatprep.mubr.msk.f32.mxu0 %vm671_vm1, %v1198_v46 }
 0x392   : > { %3873 = vmatpush3.msra.mxu0 %v1543_v43  ;;  %3867 = vmatprep.mubr.msk.f32.mxu1 %vm671_vm1, %v3486_v47 }
 0x393   : > { %3854 = vmatmul.mubr.msk.f32.gmra.mxu0 %vm671_vm1, %v1199_v49  ;;  %3874 = vmatprep.subr.mxu0 %v1541_v48  ;;  %v3508_v49 = vld [vmem:[%s4700_s8 + $0x28] sm:$0xff] }
 0x394   : > { %3875 = vmatpush3.msra.mxu0 %v1541_v48  ;;  %3868 = vmatmul.mubr.msk.f32.gmra.mxu1 %vm671_vm1, %v3487_v50  ;;  %v3509_v50 = vld [vmem:[%s4700_s8 + $0x30] sm:$0xff] }
 0x395   : > { %3876 = vmatprep.subr.mxu0 %v1539_v52  ;;  %3878 = vmatprep.mubr.msk.f32.mxu0 %vm671_vm1, %v3492_v51  ;;  %v3510_v51 = vld [vmem:[%s4700_s8 + $0x38] sm:$0xff] }
 0x396   : > { %3877 = vmatpush3.msra.mxu0 %v1539_v52  ;;  %1730 = vmatprep.mubr.bf16.mxu1 %v4015_v2  ;;  %v1751_v52 = vld [vmem:[%s4700_s8] sm:$0xff] }
 0x397   : > { %3879 = vmatmul.mubr.msk.f32.vlgmr.msra.gmra.mxu0 %vm671_vm1, %v3493_v53  ;;  %1710 = vmatprep.subr.bf16.mxu1 %v3971_v56  ;;  %v1752_v53 = vld [vmem:[%s4700_s8 + $0x8] sm:$0xff]  ;;  %v3519_v56 = vld [vmem:[%s4700_s8 + $0x40] sm:$0xff] }
 0x398   : > { %3881 = vmatprep.mubr.msk.f32.mxu0 %vm671_vm1, %v3494_v54  ;;  %1711 = vmatpush1.bf16.msra.mxu1 %v3969_v57  ;;  %v1753_v54 = vld [vmem:[%s4700_s8 + $0x10] sm:$0xff] }
 0x399   : > { %1712 = vmatprep.subr.bf16.mxu1 %v3974_v58  ;;  %v3520_v58 = vld [vmem:[%s4700_s8 + $0x48] sm:$0xff] }
 0x39b   : > { %3882 = vmatmul.mubr.msk.f32.gmra.mxu0 %vm671_vm1, %v3495_v55  ;;  %v1754_v55 = vld [vmem:[%s4700_s8 + $0x18] sm:$0xff] }
 0x39c   : > { %1713 = vmatpush1.bf16.msra.mxu1 %v3972_v59  ;;  %3892 = vmatprep.mubr.msk.f32.mxu0 %vm671_vm1, %v3507_v40  ;;  %v3521_v59 = vld [vmem:[%s4700_s8 + $0x50] sm:$0xff] }
 0x445   : > { %v3838_v60 = vpop.f32.mrf.mxu0 }
 0x447   : > { %v1299_v61 = vpop.f32.mrf.mxu0 }
 0x44a   : > { %v3841_v62 = vpop.f32.mrf.mxu0 }
 0x44c   : > { %v1309_v63 = vpop.f32.mrf.mxu0 }
 0x44f   : > { %v3852_v0 = vpop.f32.mrf.mxu0 }
 0x450   : > { %v3866_v1 = vpop.f32.mrf.mxu1  ;;  %v1402_v4 = vadd.f32 %v3852_v0, %v3838_v60 }
 0x451   : > { %v1396_v3 = vpop.f32.mrf.mxu0 }
 0x452   : > { %v1510_v5 = vpop.f32.mrf.mxu1  ;;  %v1397_v7 = vadd.f32 %v1396_v3, %v1299_v61  ;;  %v1530_v10 = vadd.f32 %v3866_v1, %v1402_v4  ;;  %v3522_v61 = vld [vmem:[%s4700_s8 + $0x58] sm:$0xff]  ;;  %v3528_v1 = vld [vmem:[%s4700_s8 + $0x68] sm:$0xff]  ;;  %v3529_v3 = vld [vmem:[%s4700_s8 + $0x70] sm:$0xff] }
 0x453   : > { %v3855_v6 = vpop.f32.mrf.mxu0  ;;  %v3530_v4 = vld [vmem:[%s4700_s8 + $0x78] sm:$0xff] }
 0x454   : > { %v3869_v9 = vpop.f32.mrf.mxu1  ;;  %v1412_v13 = vadd.f32 %v3855_v6, %v3841_v62  ;;  %v1529_v14 = vadd.f32 %v1510_v5, %v1397_v7  ;;  %v3527_v62 = vld [vmem:[%s4700_s8 + $0x60] sm:$0xff]  ;;  %v2240_v7 = vld [vmem:[%s4702_s10 + $0xc8] sm:$0xff] }
 0x455   : > { %v1406_v8 = vpop.f32.mrf.mxu0  ;;  %v2239_v5 = vld [vmem:[%s4702_s10 + $0xc0] sm:$0xff] }
 0x456   : > { %v1407_v15 = vadd.f32 %v1406_v8, %v1309_v63  ;;  %v1520_v17 = vpop.f32.mrf.mxu1  ;;  %v1532_v22 = vadd.f32 %v3869_v9, %v1412_v13  ;;  %v2243_v6 = vld [vmem:[%s4702_s10 + $0xe0] sm:$0xff]  ;;  %v2244_v9 = vld [vmem:[%s4702_s10 + $0xe8] sm:$0xff] }
 0x457   : > { %v3880_v11 = vpop.f32.mrf.mxu0  ;;  %v3561_v8 = vcombine.high %v2239_v5, %v2243_v6  ;;  %v2231_v13 = vld [vmem:[%s4702_s10 + $0x80] sm:$0xff] }
 0x458   : > { %v1648_v16 = vadd.f32 %v3880_v11, %v1530_v10  ;;  %v1531_v23 = vadd.f32 %v1520_v17, %v1407_v15  ;;  %v3560_v10 = vcombine.low %v2239_v5, %v2243_v6  ;;  %v3562_v11 = vcombine.low %v2240_v7, %v2244_v9  ;;  %v2232_v15 = vld [vmem:[%s4702_s10 + $0x88] sm:$0xff] }
 0x459   : > { %v1628_v18 = vpop.f32.mrf.mxu0  ;;  %2421 = vmatprep.subr.bf16.mxu1 %v3561_v8  ;;  %v2236_v17 = vld [vmem:[%s4702_s10 + $0xa8] sm:$0xff] }
 0x45a   : > { %v1659_v19 = vadd.f32 %v3500_v12, %v1648_v16  ;;  %v1647_v20 = vadd.f32 %v1628_v18, %v1529_v14  ;;  %v2235_v14 = vld [vmem:[%s4702_s10 + $0xa0] sm:$0xff] }
 0x45b   : > { %v3883_v21 = vpop.f32.mrf.mxu0  ;;  %v3553_v16 = vcombine.high %v2231_v13, %v2235_v14  ;;  %v3552_v18 = vcombine.low %v2231_v13, %v2235_v14  ;;  %v2234_v13 = vld [vmem:[%s4702_s10 + $0x98] sm:$0xff] }
 0x45c   : > { %v1658_v24 = vadd.f32 %v3500_v12, %v1647_v20  ;;  %v1663_v26 = vmax.f32 %v1659_v19, 0.0  ;;  %v1650_v28 = vadd.f32 %v3883_v21, %v1532_v22  ;;  %v3554_v19 = vcombine.low %v2232_v15, %v2236_v17  ;;  %v2223_v21 = vld [vmem:[%s4702_s10 + $0x40] sm:$0xff]  ;;  %v2238_v14 = vld [vmem:[%s4702_s10 + $0xb8] sm:$0xff] }
 0x45d   : > { %v1638_v25 = vpop.f32.mrf.mxu0  ;;  %v3555_v20 = vcombine.high %v2232_v15, %v2236_v17  ;;  %v2227_v22 = vld [vmem:[%s4702_s10 + $0x60] sm:$0xff] }
 0x45e   : > { %v1662_v27 = vmax.f32 %v1658_v24, 0.0  ;;  %v1649_v29 = vadd.f32 %v1638_v25, %v1531_v23  ;;  %v1661_v32 = vadd.f32 %v3500_v12, %v1650_v28  ;;  %v2224_v23 = vld [vmem:[%s4702_s10 + $0x48] sm:$0xff]  ;;  %v3545_v24 = vcombine.high %v2223_v21, %v2227_v22 }
 0x45f   : > { %v2228_v25 = vld [vmem:[%s4702_s10 + $0x68] sm:$0xff] }
 0x460   : > { %v1666_v30 = vpack.c.bf16 %v1663_v26, %v1662_v27  ;;  %v1660_v31 = vadd.f32 %v3500_v12, %v1649_v29  ;;  %v1665_v34 = vmax.f32 %v1661_v32, 0.0  ;;  %v3563_v12 = vcombine.high %v2240_v7, %v2244_v9  ;;  %v2215_v29 = vld [vmem:[%s4702_s10] sm:$0xff] }
 0x461   : > { %v3544_v26 = vcombine.low %v2223_v21, %v2227_v22  ;;  %v3546_v27 = vcombine.low %v2224_v23, %v2228_v25  ;;  %v3547_v28 = vcombine.high %v2224_v23, %v2228_v25  ;;  %v3559_v22 = vcombine.high %v2234_v13, %v2238_v14  ;;  %v2225_v23 = vld [vmem:[%s4702_s10 + $0x50] sm:$0xff]  ;;  %v2226_v25 = vld [vmem:[%s4702_s10 + $0x58] sm:$0xff] }
 0x462   : > { %3505 = vmatmul.mubr.msk.bf16.vlgmr.msra.gmra.mxu1 %vm671_vm1, %v1666_v30  ;;  %v1664_v33 = vmax.f32 %v1660_v31, 0.0  ;;  %v2219_v30 = vld [vmem:[%s4702_s10 + $0x20] sm:$0xff]  ;;  %v2216_v31 = vld [vmem:[%s4702_s10 + $0x8] sm:$0xff] }
 0x463   : > { %1740 = vmatprep.mubr.bf16.mxu1 %v4015_v2  ;;  %2422 = vmatpush1.bf16.msra.mxu1 %v3560_v10  ;;  %v3537_v32 = vcombine.high %v2215_v29, %v2219_v30  ;;  %v2233_v10 = vld [vmem:[%s4702_s10 + $0x90] sm:$0xff] }
 0x464   : > { %v1667_v35 = vpack.c.bf16 %v1665_v34, %v1664_v33  ;;  %2423 = vmatprep.subr.bf16.mxu1 %v3553_v16  ;;  %v2220_v33 = vld [vmem:[%s4702_s10 + $0x28] sm:$0xff]  ;;  %v3536_v34 = vcombine.low %v2215_v29, %v2219_v30  ;;  %v3558_v29 = vcombine.low %v2234_v13, %v2238_v14 }
 0x467   : > { %2424 = vmatpush1.bf16.msra.mxu1 %v3552_v18 }
 0x468   : > { %2425 = vmatprep.subr.bf16.mxu1 %v3545_v24  ;;  %v2229_v24 = vld [vmem:[%s4702_s10 + $0x70] sm:$0xff] }
 0x46a   : > { %3506 = vmatmul.mubr.msk.bf16.gmra.mxu1 %vm671_vm1, %v1667_v35  ;;  %v3538_v35 = vcombine.low %v2216_v31, %v2220_v33 }
 0x46b   : > { %2445 = vmatprep.mubr.bf16.mxu1 %v4015_v2  ;;  %2426 = vmatpush1.bf16.msra.mxu1 %v3544_v26  ;;  %v2230_v26 = vld [vmem:[%s4702_s10 + $0x78] sm:$0xff] }
 0x46c   : > { %2427 = vmatprep.subr.bf16.mxu1 %v3537_v32  ;;  %v3551_v32 = vcombine.high %v2226_v25, %v2230_v26 }
 0x46f   : > { %2428 = vmatpush1.bf16.msra.mxu1 %v3536_v34  ;;  %v2221_v34 = vld [vmem:[%s4702_s10 + $0x30] sm:$0xff] }
 0x522   : > { %v1732_v36 = vpop.f32.mrf.mxu1 }
 0x524   : > { %v4343_v37 = vpop.f32.mrf.mxu1 }
 0x526   : > { %v1736_v38 = vpop.f32.mrf.mxu1 }
 0x528   : > { %v1738_v39 = vpop.f32.mrf.mxu1 }
 0x52a   : > { %v1742_v41 = vpop.f32.mrf.mxu1 }
 0x52b   : > { %1768 = vrot.lane.b32.xlu1 %v1742_v41, %s4016_s27 }
 0x52c   : > { %v1744_v42 = vpop.f32.mrf.mxu1 }
 0x52e   : > { %v1746_v43 = vpop.f32.mrf.mxu1 }
 0x52f   : > { %1764 = vrot.lane.b32.xlu1 %v1732_v36, %s4016_s27  ;;  %1770 = vrot.lane.b32.xlu0 %v1746_v43, %s4016_s27 }
 0x530   : > { %v1748_v44 = vpop.f32.mrf.mxu1 }
 0x533   : > { %2089 = vrot.lane.b32.xlu1 %v1744_v42, %s4016_s27  ;;  %1766 = vrot.lane.b32.xlu0 %v1736_v38, %s4016_s27 }
 0x537   : > { %2085 = vrot.lane.b32.xlu1 %v4343_v37, %s4016_s27  ;;  %2091 = vrot.lane.b32.xlu0 %v1748_v44, %s4016_s27 }
 0x53b   : > { %2087 = vrot.lane.b32.xlu0 %v1738_v39, %s4016_s27 }
 0x59d   : > { %v1769_v45 = vpop.permute.xlu1 %1768 }
 0x5a1   : > { %v1771_v46 = vpop.permute.xlu0 %1770  ;;  %v1765_v48 = vpop.permute.xlu1 %1764 }
 0x5a2   : > { %3884 = vmatprep.subr.mxu0 %v1771_v46 }
 0x5a3   : > { %3885 = vmatpush3.msra.mxu0 %v1771_v46 }
 0x5a4   : > { %3886 = vmatprep.subr.mxu0 %v1769_v45 }
 0x5a5   : > { %3887 = vmatpush3.msra.mxu0 %v1769_v45  ;;  %v1767_v47 = vpop.permute.xlu0 %1766  ;;  %v2090_v60 = vpop.permute.xlu1 %2089 }
 0x5a6   : > { %3888 = vmatprep.subr.mxu0 %v1767_v47 }
 0x5a7   : > { %3889 = vmatpush3.msra.mxu0 %v1767_v47 }
 0x5a8   : > { %3890 = vmatprep.subr.mxu0 %v1765_v48 }
 0x5a9   : > { %3891 = vmatpush3.msra.mxu0 %v1765_v48  ;;  %v2092_v57 = vpop.permute.xlu0 %2091  ;;  %v2086_v0 = vpop.permute.xlu1 %2085 }
 0x5aa   : > { %3893 = vmatmul.mubr.msk.f32.vlgmr.msra.gmra.mxu0 %vm671_vm1, %v3508_v49  ;;  %3898 = vmatprep.subr.mxu0 %v1746_v43 }
 0x5ab   : > { %3899 = vmatpush3.msra.mxu0 %v1746_v43  ;;  %3895 = vmatprep.mubr.msk.f32.mxu0 %vm671_vm1, %v3509_v50 }
 0x5ac   : > { %3900 = vmatprep.subr.mxu0 %v1742_v41 }
 0x5ad   : > { %3901 = vmatpush3.msra.mxu0 %v1742_v41  ;;  %v2088_v63 = vpop.permute.xlu0 %2087  ;;  %v2246_v41 = vld [vmem:[%s4702_s10 + $0xf8] sm:$0xff] }
 0x5ae   : > { %3896 = vmatmul.mubr.msk.f32.gmra.mxu0 %vm671_vm1, %v3510_v51  ;;  %3902 = vmatprep.subr.mxu0 %v1736_v38 }
 0x5af   : > { %3903 = vmatpush3.msra.mxu0 %v1736_v38  ;;  %3906 = vmatprep.mubr.msk.f32.mxu0 %vm671_vm1, %v1751_v52  ;;  %v2245_v38 = vld [vmem:[%s4702_s10 + $0xf0] sm:$0xff] }
 0x5b0   : > { %3904 = vmatprep.subr.mxu0 %v1732_v36 }
 0x5b1   : > { %3905 = vmatpush3.msra.mxu0 %v1732_v36  ;;  %v3539_v36 = vcombine.high %v2216_v31, %v2220_v33  ;;  %v3549_v31 = vcombine.high %v2225_v23, %v2229_v24  ;;  %v2217_v33 = vld [vmem:[%s4702_s10 + $0x10] sm:$0xff] }
 0x5b2   : > { %3907 = vmatmul.mubr.msk.f32.vlgmr.msra.gmra.mxu0 %vm671_vm1, %v1752_v53  ;;  %3912 = vmatprep.subr.mxu0 %v1748_v44 }
 0x5b3   : > { %3913 = vmatpush3.msra.mxu0 %v1748_v44  ;;  %3909 = vmatprep.mubr.msk.f32.mxu0 %vm671_vm1, %v1753_v54 }
 0x5b4   : > { %3914 = vmatprep.subr.mxu0 %v1744_v42 }
 0x5b5   : > { %3915 = vmatpush3.msra.mxu0 %v1744_v42 }
 0x5b6   : > { %3910 = vmatmul.mubr.msk.f32.gmra.mxu0 %vm671_vm1, %v1754_v55  ;;  %3916 = vmatprep.subr.mxu0 %v1738_v39 }
 0x5b7   : > { %3917 = vmatpush3.msra.mxu0 %v1738_v39  ;;  %3920 = vmatprep.mubr.msk.f32.mxu0 %vm671_vm1, %v3519_v56  ;;  %v2242_v39 = vld [vmem:[%s4702_s10 + $0xd8] sm:$0xff] }
 0x5b8   : > { %3918 = vmatprep.subr.mxu0 %v4343_v37  ;;  %v3566_v43 = vcombine.low %v2242_v39, %v2246_v41  ;;  %v3567_v44 = vcombine.high %v2242_v39, %v2246_v41  ;;  %v3550_v39 = vcombine.low %v2226_v25, %v2230_v26  ;;  %v3541_v41 = vcombine.high %v2217_v33, %v2221_v34  ;;  %v3597_v25 = vld [vmem:[%s4703_s11 + $0x68] sm:$0xff]  ;;  %v3590_v26 = vld [vmem:[%s4703_s11 + $0x50] sm:$0xff] }
 0x5b9   : > { %3919 = vmatpush3.msra.mxu0 %v4343_v37  ;;  %v2241_v37 = vld [vmem:[%s4702_s10 + $0xd0] sm:$0xff] }
 0x5ba   : > { %3921 = vmatmul.mubr.msk.f32.vlgmr.msra.gmra.mxu0 %vm671_vm1, %v3520_v58  ;;  %3926 = vmatprep.subr.mxu0 %v2092_v57  ;;  %v3565_v40 = vcombine.high %v2241_v37, %v2245_v38  ;;  %v3564_v42 = vcombine.low %v2241_v37, %v2245_v38  ;;  %v3548_v38 = vcombine.low %v2225_v23, %v2229_v24  ;;  %v3596_v23 = vld [vmem:[%s4703_s11 + $0x60] sm:$0xff]  ;;  %v3589_v24 = vld [vmem:[%s4703_s11 + $0x48] sm:$0xff] }
 0x5bb   : > { %3927 = vmatpush3.msra.mxu0 %v2092_v57  ;;  %3923 = vmatprep.mubr.msk.f32.mxu0 %vm671_vm1, %v3521_v59 }
 0x5bc   : > { %3928 = vmatprep.subr.mxu0 %v2090_v60  ;;  %2527 = vmatprep.subr.bf16.mxu1 %v3565_v40 }
 0x5bd   : > { %3929 = vmatpush3.msra.mxu0 %v2090_v60 }
 0x5be   : > { %3924 = vmatmul.mubr.msk.f32.gmra.mxu0 %vm671_vm1, %v3522_v61  ;;  %3930 = vmatprep.subr.mxu0 %v2088_v63  ;;  %v3535_v61 = vld [vmem:[%s4701_s9] ss:$0 sm:$0xff] }
 0x5bf   : > { %3931 = vmatpush3.msra.mxu0 %v2088_v63  ;;  %3934 = vmatprep.mubr.msk.f32.mxu0 %vm671_vm1, %v3527_v62 }
 0x5c0   : > { %3932 = vmatprep.subr.mxu0 %v2086_v0 }
 0x5c1   : > { %3933 = vmatpush3.msra.mxu0 %v2086_v0 }
 0x5c2   : > { %3935 = vmatmul.mubr.msk.f32.vlgmr.msra.gmra.mxu0 %vm671_vm1, %v3528_v1  ;;  %2474 = vmatprep.subr.bf16.mxu0 %v3563_v12  ;;  %v2237_v12 = vld [vmem:[%s4702_s10 + $0xb0] sm:$0xff] }
 0x5c3   : > { %3937 = vmatprep.mubr.msk.f32.mxu0 %vm671_vm1, %v3529_v3  ;;  %2475 = vmatpush1.bf16.msra.mxu0 %v3562_v11  ;;  %v3557_v21 = vcombine.high %v2233_v10, %v2237_v12 }
 0x5c4   : > { %2476 = vmatprep.subr.bf16.mxu0 %v3555_v20 }
 0x5c6   : > { %3938 = vmatmul.mubr.msk.f32.gmra.mxu0 %vm671_vm1, %v3530_v4 }
 0x5c7   : > { %2498 = vmatprep.mubr.bf16.mxu0 %v4015_v2  ;;  %2477 = vmatpush1.bf16.msra.mxu0 %v3554_v19 }
 0x5c8   : > { %2478 = vmatprep.subr.bf16.mxu0 %v3547_v28  ;;  %v3556_v28 = vcombine.low %v2233_v10, %v2237_v12  ;;  %v3577_v10 = vld [vmem:[%s4703_s11 + $0x28] sm:$0xff] }
 0x5cb   : > { %2479 = vmatpush1.bf16.msra.mxu0 %v3546_v27 }
 0x5cc   : > { %2480 = vmatprep.subr.bf16.mxu0 %v3539_v36  ;;  %v2222_v36 = vld [vmem:[%s4702_s10 + $0x38] sm:$0xff] }
 0x5cf   : > { %2481 = vmatpush1.bf16.msra.mxu0 %v3538_v35  ;;  %v2218_v35 = vld [vmem:[%s4702_s10 + $0x18] sm:$0xff] }
 0x5d0   : > { %2580 = vmatprep.subr.bf16.mxu0 %v3567_v44  ;;  %v3542_v44 = vcombine.low %v2218_v35, %v2222_v36 }
 0x66a   : > { %v3894_v45 = vpop.f32.mrf.mxu0 }
 0x66c   : > { %v1854_v46 = vpop.f32.mrf.mxu0 }
 0x66e   : > { %v3897_v47 = vpop.f32.mrf.mxu0 }
 0x670   : > { %v1864_v48 = vpop.f32.mrf.mxu0 }
 0x672   : > { %v3908_v49 = vpop.f32.mrf.mxu0 }
 0x673   : > { %v1957_v56 = vadd.f32 %v3908_v49, %v3894_v45  ;;  %v4019_v45 = vmov 0.0  }
 0x674   : > { %v1951_v50 = vpop.f32.mrf.mxu0 }
 0x675   : > { %v1952_v58 = vadd.f32 %v1951_v50, %v1854_v46 }
 0x676   : > { %v3911_v51 = vpop.f32.mrf.mxu0 }
 0x677   : > { %v1967_v1 = vadd.f32 %v3911_v51, %v3897_v47 }
 0x678   : > { %v1961_v52 = vpop.f32.mrf.mxu0 }
 0x679   : > { %v1962_v3 = vadd.f32 %v1961_v52, %v1864_v48 }
 0x67a   : > { %v3922_v53 = vpop.f32.mrf.mxu0 }
 0x67b   : > { %v2073_v59 = vadd.f32 %v3922_v53, %v1957_v56 }
 0x67c   : > { %v2053_v54 = vpop.f32.mrf.mxu0 }
 0x67d   : > { %v2072_v62 = vadd.f32 %v2053_v54, %v1952_v58 }
 0x67e   : > { %v3925_v55 = vpop.f32.mrf.mxu0 }
 0x67f   : > { %v2075_v7 = vadd.f32 %v3925_v55, %v1967_v1 }
 0x680   : > { %v2063_v57 = vpop.f32.mrf.mxu0 }
 0x681   : > { %v2074_v8 = vadd.f32 %v2063_v57, %v1962_v3 }
 0x682   : > { %v3936_v60 = vpop.f32.mrf.mxu0 }
 0x683   : > { %v2195_v63 = vadd.f32 %v3936_v60, %v2073_v59 }
 0x684   : > { %v2175_v0 = vpop.f32.mrf.mxu0 }
 0x685   : > { %v2206_v4 = vadd.f32 %v3535_v61, %v2195_v63  ;;  %v2194_v5 = vadd.f32 %v2175_v0, %v2072_v62 }
 0x686   : > { %v3939_v6 = vpop.f32.mrf.mxu0 }
 0x687   : > { %v2205_v9 = vadd.f32 %v3535_v61, %v2194_v5  ;;  %v2210_v15 = vmax.f32 %v2206_v4, 0.0  ;;  %v2197_v17 = vadd.f32 %v3939_v6, %v2075_v7  ;;  %v3576_v4 = vld [vmem:[%s4703_s11 + $0x20] sm:$0xff] }
 0x688   : > { %v2185_v11 = vpop.f32.mrf.mxu0  ;;  %v2625_v5 = vld [vmem:[%s4703_s11] sm:$0xff] }
 0x689   : > { %v2209_v16 = vmax.f32 %v2205_v9, 0.0  ;;  %v2196_v18 = vadd.f32 %v2185_v11, %v2074_v8  ;;  %v2208_v27 = vadd.f32 %v3535_v61, %v2197_v17  ;;  %v2626_v11 = vld [vmem:[%s4703_s11 + $0x8] sm:$0xff] }
 0x68b   : > { %v2213_v19 = vpack.c.bf16 %v2210_v15, %v2209_v16  ;;  %v2207_v20 = vadd.f32 %v3535_v61, %v2196_v18  ;;  %v2212_v37 = vmax.f32 %v2208_v27, 0.0  ;;  %v3578_v16 = vld [vmem:[%s4703_s11 + $0x30] sm:$0xff] }
 0x68c   : > { %v3598_v27 = vld [vmem:[%s4703_s11 + $0x70] sm:$0xff] }
 0x68d   : > { %3568 = vmatmul.mubr.msk.bf16.vlgmr.msra.gmra.mxu1 %vm1140_vm2, %v2213_v19  ;;  %3570 = vmatmul.mubr.msk.bf16.vlgmr.msra.gmra.mxu0 %vm1140_vm2, %v2213_v19  ;;  %v2211_v30 = vmax.f32 %v2207_v20, 0.0  ;;  %v3579_v20 = vld [vmem:[%s4703_s11 + $0x38] sm:$0xff] }
 0x68e   : > { %2528 = vmatpush1.bf16.msra.mxu1 %v3564_v42  ;;  %2581 = vmatpush1.bf16.msra.mxu0 %v3566_v43  ;;  %v3543_v42 = vcombine.high %v2218_v35, %v2222_v36  ;;  %v3540_v43 = vcombine.low %v2217_v33, %v2221_v34  ;;  %v3978_v33 = vld [vmem:[%s4705_s13 + $0x30] sm:$0xff]   ;;  %v3979_v34 = vld [vmem:[%s4705_s13 + $0x68] sm:$0xff]   ;;  %v3981_v36 = vld [vmem:[%s4705_s13 + $0x60] sm:$0xff]  }
 0x68f   : > { %2529 = vmatprep.subr.bf16.mxu1 %v3557_v21  ;;  %2582 = vmatprep.subr.bf16.mxu0 %v3559_v22  ;;  %v2214_v40 = vpack.c.bf16 %v2212_v37, %v2211_v30  ;;  %v2628_v21 = vld [vmem:[%s4703_s11 + $0x18] sm:$0xff]  ;;  %v3588_v22 = vld [vmem:[%s4703_s11 + $0x40] sm:$0xff]  ;;  %v3980_v35 = vld [vmem:[%s4705_s13 + $0x28] sm:$0xff]  }
 0x690   : > { %2455 = vmatprep.mubr.bf16.mxu1 %v4015_v2  ;;  %2508 = vmatprep.mubr.bf16.mxu0 %v4015_v2  ;;  %v3975_v30 = vld [vmem:[%s4705_s13 + $0x78] sm:$0xff]   ;;  %v3982_v37 = vld [vmem:[%s4705_s13 + $0x20] sm:$0xff]  }
 0x692   : > { %2530 = vmatpush1.bf16.msra.mxu1 %v3556_v28  ;;  %2583 = vmatpush1.bf16.msra.mxu0 %v3558_v29  ;;  %v3591_v28 = vld [vmem:[%s4703_s11 + $0x58] sm:$0xff] }
 0x693   : > { %2531 = vmatprep.subr.bf16.mxu1 %v3549_v31  ;;  %2584 = vmatprep.subr.bf16.mxu0 %v3551_v32  ;;  %v3599_v29 = vld [vmem:[%s4703_s11 + $0x78] sm:$0xff]  ;;  %v3977_v32 = vld [vmem:[%s4705_s13 + $0x70] sm:$0xff]  }
 0x694   : > { %v3976_v31 = vld [vmem:[%s4705_s13 + $0x38] sm:$0xff]  }
 0x695   : > { %3569 = vmatmul.mubr.msk.bf16.gmra.mxu1 %vm1140_vm2, %v2214_v40  ;;  %3571 = vmatmul.mubr.msk.bf16.gmra.mxu0 %vm1140_vm2, %v2214_v40 }
 0x696   : > { %2532 = vmatpush1.bf16.msra.mxu1 %v3548_v38  ;;  %2585 = vmatpush1.bf16.msra.mxu0 %v3550_v39  ;;  %v3983_v38 = vld [vmem:[%s4705_s13 + $0x58] sm:$0xff]  }
 0x697   : > { %2533 = vmatprep.subr.bf16.mxu1 %v3541_v41  ;;  %2586 = vmatprep.subr.bf16.mxu0 %v3543_v42  ;;  %v3984_v39 = vld [vmem:[%s4705_s13 + $0x18] sm:$0xff]   ;;  %v3986_v41 = vld [vmem:[%s4705_s13 + $0x10] sm:$0xff]   ;;  %v3987_v42 = vld [vmem:[%s4705_s13 + $0x48] sm:$0xff]  }
 0x698   : > { %2551 = vmatprep.mubr.bf16.mxu1 %v4015_v2  ;;  %2604 = vmatprep.mubr.bf16.mxu0 %v4015_v2 }
 0x69a   : > { %2534 = vmatpush1.bf16.msra.mxu1 %v3540_v43  ;;  %2587 = vmatpush1.bf16.msra.mxu0 %v3542_v44  ;;  %v3988_v43 = vld [vmem:[%s4705_s13 + $0x8] sm:$0xff]   ;;  %v3989_v44 = vld [vmem:[%s4705_s13 + $0x40] sm:$0xff]  }
 0x69d   : > { %3572 = vmatmul.mubr.msk.bf16.vlgmr.msra.gmra.mxu1 %vm1140_vm2, %v2213_v19  ;;  %3574 = vmatmul.mubr.msk.bf16.vlgmr.msra.gmra.mxu0 %vm1140_vm2, %v2213_v19  ;;  %v2627_v19 = vld [vmem:[%s4703_s11 + $0x10] sm:$0xff] }
 0x69e   : > { %2561 = vmatprep.mubr.bf16.mxu1 %v4015_v2  ;;  %2614 = vmatprep.mubr.bf16.mxu0 %v4015_v2 }
 0x6a5   : > { %3573 = vmatmul.mubr.msk.bf16.gmra.mxu1 %vm1140_vm2, %v2214_v40  ;;  %3575 = vmatmul.mubr.msk.bf16.gmra.mxu0 %vm1140_vm2, %v2214_v40  ;;  %v3985_v40 = vld [vmem:[%s4705_s13 + $0x50] sm:$0xff]  }
 0x6a6   : > { %2710 = vmatprep.mubr.f32.mxu1 %v4019_v45  ;;  %2811 = vmatprep.mubr.f32.mxu0 %v4019_v45 }
 0x74d   : > { %v2447_v46 = vpop.f32.mrf.mxu1  ;;  %v2500_v47 = vpop.f32.mrf.mxu0 }
 0x74f   : > { %v2449_v48 = vpop.f32.mrf.mxu1  ;;  %v2502_v49 = vpop.f32.mrf.mxu0 }
 0x751   : > { %v2451_v50 = vpop.f32.mrf.mxu1  ;;  %v2504_v51 = vpop.f32.mrf.mxu0 }
 0x753   : > { %v2453_v52 = vpop.f32.mrf.mxu1  ;;  %v2506_v53 = vpop.f32.mrf.mxu0 }
 0x755   : > { %v2457_v54 = vpop.f32.mrf.mxu1  ;;  %v2510_v55 = vpop.f32.mrf.mxu0 }
 0x757   : > { %v2459_v2 = vpop.f32.mrf.mxu1  ;;  %v2512_v56 = vpop.f32.mrf.mxu0 }
 0x759   : > { %v2461_v57 = vpop.f32.mrf.mxu1  ;;  %v2514_v58 = vpop.f32.mrf.mxu0 }
 0x75b   : > { %v2463_v59 = vpop.f32.mrf.mxu1  ;;  %v2516_v60 = vpop.f32.mrf.mxu0 }
 0x75c   : > { %2670 = vmatprep.subr.mxu1 %v2516_v60  ;;  %2771 = vmatprep.subr.mxu0 %v2463_v59 }
 0x75d   : > { %v4536_v61 = vpop.f32.mrf.mxu1  ;;  %v4538_v62 = vpop.f32.mrf.mxu0  ;;  %2671 = vmatpush1.msra.mxu1 %v2514_v58  ;;  %2772 = vmatpush1.msra.mxu0 %v2461_v57  ;;  %v3066_v58 = vlaneseq }
 0x75e   : > { %2672 = vmatprep.subr.mxu1 %v2512_v56  ;;  %2773 = vmatprep.subr.mxu0 %v2459_v2 }
 0x75f   : > { %v2555_v63 = vpop.f32.mrf.mxu1  ;;  %v2608_v0 = vpop.f32.mrf.mxu0  ;;  %2673 = vmatpush1.msra.mxu1 %v2510_v55  ;;  %2774 = vmatpush1.msra.mxu0 %v2457_v54 }
 0x760   : > { %2674 = vmatprep.subr.mxu1 %v2506_v53  ;;  %2775 = vmatprep.subr.mxu0 %v2453_v52 }
 0x761   : > { %v2557_v1 = vpop.f32.mrf.mxu1  ;;  %v2610_v3 = vpop.f32.mrf.mxu0  ;;  %2675 = vmatpush1.msra.mxu1 %v2504_v51  ;;  %2776 = vmatpush1.msra.mxu0 %v2451_v50 }
 0x762   : > { %2676 = vmatprep.subr.mxu1 %v2502_v49  ;;  %2777 = vmatprep.subr.mxu0 %v2449_v48 }
 0x763   : > { %v2559_v6 = vpop.f32.mrf.mxu1  ;;  %v2612_v7 = vpop.f32.mrf.mxu0  ;;  %2677 = vmatpush1.msra.mxu1 %v2500_v47  ;;  %2778 = vmatpush1.msra.mxu0 %v2447_v46 }
 0x764   : > { %3580 = vmatmul.mubr.msk.f32.vlgmr.msra.gmra.mxu1 %vm671_vm1, %v3576_v4  ;;  %3584 = vmatmul.mubr.msk.f32.vlgmr.msra.gmra.mxu0 %vm671_vm1, %v2625_v5 }
 0x765   : > { %v2563_v8 = vpop.f32.mrf.mxu1  ;;  %v2616_v9 = vpop.f32.mrf.mxu0  ;;  %2716 = vmatprep.mubr.f32.mxu1 %v4019_v45  ;;  %2817 = vmatprep.mubr.f32.mxu0 %v4019_v45 }
 0x767   : > { %v2565_v12 = vpop.f32.mrf.mxu1  ;;  %v2618_v13 = vpop.f32.mrf.mxu0 }
 0x768   : > { %3581 = vmatmul.mubr.msk.f32.gmra.mxu1 %vm671_vm1, %v3577_v10  ;;  %3585 = vmatmul.mubr.msk.f32.gmra.mxu0 %vm671_vm1, %v2626_v11  ;;  %v3064_v10 = vld [vmem:[%s4704_s12] sm:$0x3] }
 0x769   : > { %v2567_v14 = vpop.f32.mrf.mxu1  ;;  %v2620_v15 = vpop.f32.mrf.mxu0  ;;  %2722 = vmatprep.mubr.f32.mxu1 %v4019_v45  ;;  %2823 = vmatprep.mubr.f32.mxu0 %v4019_v45 }
 0x76b   : > { %v2569_v17 = vpop.f32.mrf.mxu1  ;;  %v2622_v18 = vpop.f32.mrf.mxu0 }
 0x76c   : > { %3582 = vmatmul.mubr.msk.f32.gmra.mxu1 %vm671_vm1, %v3578_v16  ;;  %2877 = vmatprep.subr.mxu1 %v2569_v17 }
 0x76d   : > { %2991 = vmatprep.subr.mxu0 %v2622_v18  ;;  %2878 = vmatpush1.msra.mxu1 %v2567_v14 }
 0x76e   : > { %2992 = vmatpush1.msra.mxu0 %v2620_v15  ;;  %2879 = vmatprep.subr.mxu1 %v2565_v12 }
 0x76f   : > { %3586 = vmatmul.mubr.msk.f32.gmra.mxu0 %vm671_vm1, %v2627_v19  ;;  %2993 = vmatprep.subr.mxu0 %v2618_v13 }
 0x770   : > { %2728 = vmatprep.mubr.f32.mxu1 %v4019_v45  ;;  %2880 = vmatpush1.msra.mxu1 %v2563_v8 }
 0x771   : > { %2994 = vmatpush1.msra.mxu0 %v2616_v9  ;;  %3583 = vmatmul.mubr.msk.f32.gmra.mxu1 %vm671_vm1, %v3579_v20 }
 0x772   : > { %2881 = vmatprep.subr.mxu1 %v2559_v6  ;;  %2995 = vmatprep.subr.mxu0 %v2612_v7 }
 0x773   : > { %2829 = vmatprep.mubr.f32.mxu0 %v4019_v45  ;;  %2882 = vmatpush1.msra.mxu1 %v2557_v1 }
 0x774   : > { %2996 = vmatpush1.msra.mxu0 %v2610_v3  ;;  %2883 = vmatprep.subr.mxu1 %v2555_v63 }
 0x775   : > { %3587 = vmatmul.mubr.msk.f32.gmra.mxu0 %vm671_vm1, %v2628_v21  ;;  %2997 = vmatprep.subr.mxu0 %v2608_v0 }
 0x776   : > { %2884 = vmatpush1.msra.mxu1 %v4536_v61  ;;  %2917 = vmatprep.mubr.f32.mxu1 %v4019_v45  ;;  %v3067_v61 = vshrl.u32 %v3066_v58, 7 }
 0x777   : > { %2998 = vmatpush1.msra.mxu0 %v4538_v62  ;;  %3592 = vmatmul.mubr.msk.f32.vlgmr.msra.gmra.mxu1 %vm671_vm1, %v3588_v22 }
 0x778   : > { %3031 = vmatprep.mubr.f32.mxu0 %v4019_v45  ;;  %2923 = vmatprep.mubr.f32.mxu1 %v4019_v45  ;;  %v3072_v3 = vsub.s32 1, %v3067_v61  ;;  %v3068_v7 = vsub.s32 0, %v3067_v61 }
 0x779   : > { %3600 = vmatmul.mubr.msk.f32.vlgmr.msra.gmra.mxu0 %vm671_vm1, %v3596_v23  ;;  %3732 = vmatprep.subr.bf16.mxu1 %v3975_v30 }
 0x77a   : > { %3037 = vmatprep.mubr.f32.mxu0 %v4019_v45  ;;  %3733 = vmatpush3.bf16.msra.mxu1 %v3976_v31  ;;  %v3073_v16 = vrot.slane %v3064_v10, %v3072_v3  ;;  %v3069_v18 = vrot.slane %v3064_v10, %v3068_v7 }
 0x77b   : > { %3593 = vmatmul.mubr.msk.f32.gmra.mxu1 %vm671_vm1, %v3589_v24  ;;  %3734 = vmatprep.subr.bf16.mxu1 %v3977_v32 }
 0x77c   : > { %2929 = vmatprep.mubr.f32.mxu1 %v4019_v45 }
 0x77d   : > { %3601 = vmatmul.mubr.msk.f32.gmra.mxu0 %vm671_vm1, %v3597_v25 }
 0x77e   : > { %3043 = vmatprep.mubr.f32.mxu0 %v4019_v45  ;;  %3735 = vmatpush3.bf16.msra.mxu1 %v3978_v33 }
 0x77f   : > { %3594 = vmatmul.mubr.msk.f32.gmra.mxu1 %vm671_vm1, %v3590_v26  ;;  %3736 = vmatprep.subr.bf16.mxu1 %v3979_v34 }
 0x780   : > { %2935 = vmatprep.mubr.f32.mxu1 %v4019_v45 }
 0x781   : > { %3602 = vmatmul.mubr.msk.f32.gmra.mxu0 %vm671_vm1, %v3598_v27 }
 0x782   : > { %3049 = vmatprep.mubr.f32.mxu0 %v4019_v45  ;;  %3737 = vmatpush3.bf16.msra.mxu1 %v3980_v35  ;;  %v3990_v45 = vld [vmem:[%s4705_s13] sm:$0xff]  }
 0x783   : > { %3595 = vmatmul.mubr.msk.f32.gmra.mxu1 %vm671_vm1, %v3591_v28  ;;  %3738 = vmatprep.subr.bf16.mxu1 %v3981_v36 }
 0x785   : > { %3603 = vmatmul.mubr.msk.f32.gmra.mxu0 %vm671_vm1, %v3599_v29 }
 0x786   : > { %3739 = vmatpush3.bf16.msra.mxu1 %v3982_v37 }
 0x787   : > { %3740 = vmatprep.subr.bf16.mxu1 %v3983_v38 }
 0x78a   : > { %3741 = vmatpush3.bf16.msra.mxu1 %v3984_v39 }
 0x78b   : > { %3742 = vmatprep.subr.bf16.mxu1 %v3985_v40 }
 0x78e   : > { %3743 = vmatpush3.bf16.msra.mxu1 %v3986_v41 }
 0x78f   : > { %3744 = vmatprep.subr.bf16.mxu1 %v3987_v42 }
 0x792   : > { %3745 = vmatpush3.bf16.msra.mxu1 %v3988_v43 }
 0x793   : > { %3746 = vmatprep.subr.bf16.mxu1 %v3989_v44 }
 0x796   : > { %3747 = vmatpush3.bf16.msra.mxu1 %v3990_v45 }
 0x824   : > { %v2712_v46 = vpop.f32.mrf.mxu1  ;;  %v2813_v47 = vpop.f32.mrf.mxu0 }
 0x825   : > { %v2814_v62 = vadd.f32 %v2813_v47, %v2712_v46 }
 0x826   : > { %v2714_v48 = vpop.f32.mrf.mxu1  ;;  %v2815_v49 = vpop.f32.mrf.mxu0 }
 0x827   : > { %v2816_v1 = vadd.f32 %v2815_v49, %v2714_v48 }
 0x828   : > { %v2718_v50 = vpop.f32.mrf.mxu1  ;;  %v2819_v51 = vpop.f32.mrf.mxu0 }
 0x829   : > { %v2820_v8 = vadd.f32 %v2819_v51, %v2718_v50 }
 0x82a   : > { %v2720_v52 = vpop.f32.mrf.mxu1  ;;  %v2821_v53 = vpop.f32.mrf.mxu0 }
 0x82b   : > { %v2822_v13 = vadd.f32 %v2821_v53, %v2720_v52 }
 0x82c   : > { %v2724_v54 = vpop.f32.mrf.mxu1 }
 0x82e   : > { %v2726_v55 = vpop.f32.mrf.mxu1 }
 0x82f   : > { %v2825_v2 = vpop.f32.mrf.mxu0 }
 0x830   : > { %v2826_v23 = vadd.f32 %v2825_v2, %v2724_v54 }
 0x831   : > { %v2730_v56 = vpop.f32.mrf.mxu1  ;;  %v2827_v57 = vpop.f32.mrf.mxu0 }
 0x832   : > { %v2828_v26 = vadd.f32 %v2827_v57, %v2726_v55 }
 0x833   : > { %v2732_v59 = vpop.f32.mrf.mxu1 }
 0x835   : > { %v2831_v60 = vpop.f32.mrf.mxu0 }
 0x836   : > { %v2832_v34 = vadd.f32 %v2831_v60, %v2730_v56 }
 0x837   : > { %v2833_v63 = vpop.f32.mrf.mxu0  ;;  %v2919_v0 = vpop.f32.mrf.mxu1 }
 0x838   : > { %v2942_v4 = vadd.f32 %v2919_v0, %v2814_v62  ;;  %v2834_v40 = vadd.f32 %v2833_v63, %v2732_v59 }
 0x839   : > { %v2921_v5 = vpop.f32.mrf.mxu1  ;;  %v3033_v6 = vpop.f32.mrf.mxu0 }
 0x83a   : > { %v2943_v9 = vadd.f32 %v2921_v5, %v2816_v1  ;;  %v3056_v17 = vadd.f32 %v3033_v6, %v2942_v4  ;;  %v3604_v1 = vld [vmem:[%s4706_s14] ss:$0 sm:$0xff] }
 0x83b   : > { %v2925_v11 = vpop.f32.mrf.mxu1  ;;  %v3035_v12 = vpop.f32.mrf.mxu0 }
 0x83c   : > { %v2944_v14 = vadd.f32 %v2925_v11, %v2820_v8  ;;  %v3057_v15 = vadd.f32 %v3035_v12, %v2943_v9  ;;  %v3076_v30 = vadd.f32 %v3069_v18, %v3056_v17 }
 0x83d   : > { %v2927_v19 = vpop.f32.mrf.mxu1  ;;  %v3039_v20 = vpop.f32.mrf.mxu0 }
 0x83e   : > { %v2945_v21 = vadd.f32 %v2927_v19, %v2822_v13  ;;  %v3058_v22 = vadd.f32 %v3039_v20, %v2944_v14  ;;  %v3077_v27 = vadd.f32 %v3073_v16, %v3057_v15  ;;  %v3084_v44 = vmax.f32 %v3076_v30, 0.0 }
 0x83f   : > { %v2931_v24 = vpop.f32.mrf.mxu1  ;;  %v3041_v25 = vpop.f32.mrf.mxu0 }
 0x840   : > { %v3078_v28 = vadd.f32 %v3069_v18, %v3058_v22  ;;  %v3059_v29 = vadd.f32 %v3041_v25, %v2945_v21  ;;  %v2946_v31 = vadd.f32 %v2931_v24, %v2826_v23  ;;  %v3085_v41 = vmax.f32 %v3077_v27, 0.0 }
 0x841   : > { %v2933_v32 = vpop.f32.mrf.mxu1  ;;  %v3045_v33 = vpop.f32.mrf.mxu0 }
 0x842   : > { %v3079_v35 = vadd.f32 %v3073_v16, %v3059_v29  ;;  %v2947_v36 = vadd.f32 %v2933_v32, %v2828_v26  ;;  %v3086_v37 = vmax.f32 %v3078_v28, 0.0  ;;  %v3060_v45 = vadd.f32 %v3045_v33, %v2946_v31 }
 0x843   : > { %v2937_v38 = vpop.f32.mrf.mxu1  ;;  %v3047_v39 = vpop.f32.mrf.mxu0 }
 0x844   : > { %v3087_v42 = vmax.f32 %v3079_v35, 0.0  ;;  %v2948_v43 = vadd.f32 %v2937_v38, %v2832_v34  ;;  %v3061_v46 = vadd.f32 %v3047_v39, %v2947_v36  ;;  %v3092_v52 = vpack.c.bf16 %v3086_v37, %v3084_v44 }
 0x845   : > { %v2939_v47 = vpop.f32.mrf.mxu1  ;;  %v3051_v48 = vpop.f32.mrf.mxu0  ;;  %v3080_v56 = vadd.f32 %v3069_v18, %v3060_v45 }
 0x846   : > { %v2949_v49 = vadd.f32 %v2939_v47, %v2834_v40  ;;  %v3062_v50 = vadd.f32 %v3051_v48, %v2948_v43  ;;  %v3093_v51 = vpack.c.bf16 %v3087_v42, %v3085_v41  ;;  %v3081_v54 = vadd.f32 %v3073_v16, %v3061_v46 }
 0x847   : > { %v3053_v53 = vpop.f32.mrf.mxu0  ;;  %v3088_v61 = vmax.f32 %v3080_v56, 0.0 }
 0x848   : > { %v3082_v55 = vadd.f32 %v3069_v18, %v3062_v50  ;;  %v3063_v2 = vadd.f32 %v3053_v53, %v2949_v49  ;;  %3263 = vmatprep.mubr.bf16.mxu1 %v3093_v51  ;;  %v3089_v59 = vmax.f32 %v3081_v54, 0.0 }
 0x849   : > { %3264 = vmatmul.mubr.bf16.vlgmr.msra.gmra.mxu1 %v3092_v52 }
 0x84a   : > { %v3083_v57 = vadd.f32 %v3073_v16, %v3063_v2  ;;  %v3090_v58 = vmax.f32 %v3082_v55, 0.0 }
 0x84c   : > { %v3091_v60 = vmax.f32 %v3083_v57, 0.0  ;;  %v3094_v63 = vpack.c.bf16 %v3090_v58, %v3088_v61 }
 0x84e   : > { %v3095_v62 = vpack.c.bf16 %v3091_v60, %v3089_v59 }
 0x850   : > { %3271 = vmatprep.mubr.bf16.mxu1 %v3095_v62 }
 0x851   : > { %3272 = vmatmul.mubr.bf16.gmra.mxu1 %v3094_v63 }
 0x909   : > { %v3748_v0 = vpop.f32.mrf.mxu1 }
 0x90b   : > { %v3749_v3 = vpop.f32.mrf.mxu1 }
 0x90c   : > { %v3750_v4 = vadd.f32 %v3749_v3, %v3748_v0 }
 0x90d   : > { %v3751_v5 = vpop.f32.mrf.mxu1 }
 0x90e   : > { %v3266_v6 = vadd.f32 %v3750_v4, %v3604_v1 }
 0x90f   : > { %v3752_v7 = vpop.f32.mrf.mxu1 }
 0x910   : > { %v3621_v8 = vmul.f32 -1.442695, %v3266_v6  ;;  %v3753_v9 = vadd.f32 %v3752_v7, %v3751_v5  ;;  %3280 = vst.msk [vmem:[%s529_s23] sm:$0xff] %vm586_vm0, %v3266_v6 }
 0x911   : > { %v3754_v10 = vpop.f32.mrf.mxu1 }
 0x912   : > { %3991 = vpow2.f32 %v3621_v8  ;;  %v3269_v11 = vadd.f32 %v3753_v9, %v3604_v1 }
 0x913   : > { %v3755_v12 = vpop.f32.mrf.mxu1 }
 0x914   : > { %v3622_v13 = vmul.f32 -1.442695, %v3269_v11  ;;  %v3756_v14 = vadd.f32 %v3755_v12, %v3754_v10  ;;  %3281 = vst.msk [vmem:[%s529_s23 + $0x8] sm:$0xff] %vm586_vm0, %v3269_v11 }
 0x915   : > { %v3757_v15 = vpop.f32.mrf.mxu1 }
 0x916   : > { %3993 = vpow2.f32 %v3622_v13  ;;  %v3274_v16 = vadd.f32 %v3756_v14, %v3604_v1 }
 0x917   : > { %v3758_v17 = vpop.f32.mrf.mxu1 }
 0x918   : > { %v3623_v18 = vmul.f32 -1.442695, %v3274_v16  ;;  %v3759_v19 = vadd.f32 %v3758_v17, %v3757_v15  ;;  %3282 = vst.msk [vmem:[%s529_s23 + $0x10] sm:$0xff] %vm586_vm0, %v3274_v16 }
 0x91a   : > { %3995 = vpow2.f32 %v3623_v18  ;;  %v3277_v20 = vadd.f32 %v3759_v19, %v3604_v1 }
 0x91c   : > { %v3624_v21 = vmul.f32 -1.442695, %v3277_v20  ;;  %3283 = vst.msk [vmem:[%s529_s23 + $0x18] sm:$0xff] %vm586_vm0, %v3277_v20 }
 0x91e   : > { %3997 = vpow2.f32 %v3624_v21 }
 0x91f   : > { %v3992_v22 = vpop.eup %3991 }
 0x920   : > { %v3296_v23 = vadd.f32 1.0, %v3992_v22 }
 0x922   : > { %3999 = vrcp.f32 %v3296_v23 }
 0x923   : > { %v3994_v24 = vpop.eup %3993 }
 0x924   : > { %v3297_v25 = vadd.f32 1.0, %v3994_v24 }
 0x926   : > { %4001 = vrcp.f32 %v3297_v25 }
 0x927   : > { %v3996_v26 = vpop.eup %3995 }
 0x928   : > { %v3298_v27 = vadd.f32 1.0, %v3996_v26 }
 0x92a   : > { %4003 = vrcp.f32 %v3298_v27 }
 0x92b   : > { %v3998_v28 = vpop.eup %3997 }
 0x92c   : > { %v3299_v29 = vadd.f32 1.0, %v3998_v28 }
 0x92e   : > { %4005 = vrcp.f32 %v3299_v29 }
 0x92f   : > { %v4000_v30 = vpop.eup %3999 }
 0x930   : > { %3312 = vrot.lane.b32.xlu0 %v4000_v30, %s4020_s24 }
 0x933   : > { %v4002_v31 = vpop.eup %4001 }
 0x934   : > { %3314 = vrot.lane.b32.xlu1 %v4002_v31, %s4020_s24 }
 0x937   : > { %v4004_v32 = vpop.eup %4003 }
 0x938   : > { %3316 = vrot.lane.b32.xlu0 %v4004_v32, %s4020_s24 }
 0x93b   : > { %v4006_v33 = vpop.eup %4005 }
 0x93c   : > { %3318 = vrot.lane.b32.xlu1 %v4006_v33, %s4020_s24 }
 0x9a2   : > { %v3313_v34 = vpop.permute.xlu0 %3312 }
 0x9a3   : > { %3325 = vst.msk [vmem:[%s534_s28] sm:$0xff] %vm3324_vm3, %v3313_v34 }
 0x9a6   : > { %v3315_v35 = vpop.permute.xlu1 %3314 }
 0x9a7   : > { %3326 = vst.msk [vmem:[%s534_s28 + $0x8] sm:$0xff] %vm3324_vm3, %v3315_v35 }
 0x9aa   : > { %v3317_v36 = vpop.permute.xlu0 %3316 }
 0x9ab   : > { %3327 = vst.msk [vmem:[%s534_s28 + $0x10] sm:$0xff] %vm3324_vm3, %v3317_v36 }
 0x9ae   : > { %v3319_v37 = vpop.permute.xlu1 %3318 }
 0x9af   : > { %3328 = vst.msk [vmem:[%s534_s28 + $0x18] sm:$0xff] %vm3324_vm3, %v3319_v37 }
 0x9b0 PF: > { %s27_s21 = sadd.s32 1, %s4013_s21  }
 0x9b1   : > { %p24_p4 = scmp.ge.s32.totalorder %s27_s21, 4  }
 0x9b3   :  { %26 = sbr.rel (!%p24_p4) target bundleno = 2 (0x2), region = 134 }

</bundles_post_ra>
